<compile_context>
chip_gen: v6e
topology: v6e:2x2x1
jax: 0.10.0
libtpu: 0.0.40
codegen_flags: <defaults>
</compile_context>

<pallas_src>
import functools
import math

import jax
import jax.numpy as jnp
from jax.experimental import pallas as pl
from jax.experimental.pallas import tpu as pltpu


def _vmem_limit_bytes():
    """Scoped-VMEM limit: ~3/4 of physical VMEM (48 MiB v7x, 96 MiB v5e/v6e)."""
    cap = 64 * 1024 * 1024  # conservative physical default (v7x per-TensorCore)
    try:
        info = pltpu.get_tpu_info()
        for attr in ("vmem_capacity_bytes", "vmem_bytes", "vmem_size_bytes"):
            v = getattr(info, attr, None)
            if v:
                cap = int(v)
                break
    except Exception:
        pass
    return (cap * 3) // 4


_VMEM_LIMIT = _vmem_limit_bytes()
# Bigger row tiles amortize per-grid-step overhead; cap lower on v7x (64 MiB VMEM).
_ROW_CAP = 512 if _VMEM_LIMIT >= (72 << 20) else 256
_FFN_ROW_CAP = _ROW_CAP // 2


def _row_tile(m, cap):
    return m if m <= cap else cap


# ----------------------------------------------------------------------------
# Pallas kernels
# ----------------------------------------------------------------------------

def _qkv_kernel(x_ref, w_ref, b_ref, q_ref, k_ref, v_ref, *, d_model, q_scale):
    # x: (TM, D) f32; w: (D, 3D) bf16 pre-transposed; b: (1, 3D) f32.
    # Outputs q/k/v: (TM, D) bf16; q is pre-scaled by 1/sqrt(d_k) in f32.
    x = x_ref[...].astype(jnp.bfloat16)
    y = jax.lax.dot_general(
        x, w_ref[...],
        dimension_numbers=(((1,), (0,)), ((), ())),
        preferred_element_type=jnp.float32,
    ) + b_ref[...]
    D = d_model
    q_ref[...] = (y[:, :D] * q_scale).astype(jnp.bfloat16)
    k_ref[...] = y[:, D:2 * D].astype(jnp.bfloat16)
    v_ref[...] = y[:, 2 * D:3 * D].astype(jnp.bfloat16)


def _attn_kernel(q_ref, k_ref, v_ref, m_ref, o_ref, *w_refs, n_heads):
    # q/k/v: (1, L, D) bf16 head-interleaved (q pre-scaled); m: (1, Lq, Lk) int8.
    # TODO(synk): flash-style Lk tiling (online softmax) needed for long sequences;
    #             full (H, Lq, Lk) scores are materialized in VMEM here.
    # TODO(synk): per-head grid tiles / head packing (>=128-lane dk blocks) not
    #             implemented; heads are batched via an in-kernel reshape+einsum.
    _, Lq, D = q_ref.shape
    Lk = k_ref.shape[1]
    dk = D // n_heads

    q = q_ref[0].reshape(Lq, n_heads, dk)
    k = k_ref[0].reshape(Lk, n_heads, dk)
    v = v_ref[0].reshape(Lk, n_heads, dk)

    # scores: (H, Lq, Lk); bf16 MXU inputs, f32 accumulation. Scale already in q.
    s = jnp.einsum("qhd,khd->hqk", q, k, preferred_element_type=jnp.float32)
    mask = m_ref[0] != 0
    s = jnp.where(mask[None, :, :], jnp.float32(-1e9), s)

    # numerically-stable softmax in f32; normalization via EUP reciprocal
    s_max = jnp.max(s, axis=-1, keepdims=True)
    e = jnp.exp(s - s_max)
    denom = jnp.sum(e, axis=-1, keepdims=True)
    p = e * pl.reciprocal(denom, approx=True)

    # context: (Lq, H, dk) -> lane-dense (Lq, D), stored bf16 for the next matmul
    ctx = jnp.einsum("hqk,khd->qhd", p.astype(jnp.bfloat16), v,
                     preferred_element_type=jnp.float32)
    o_ref[0] = ctx.reshape(Lq, D).astype(jnp.bfloat16)
    if w_refs:  # attention weights are an optional module output
        w_refs[0][0] = p


def _proj_add_ln_kernel(x_ref, w_ref, b_ref, res_ref, g_ref, bt_ref, o_ref, *, eps):
    # output projection + residual add + LayerNorm fused (one HBM round trip)
    # x: (TM, D) bf16 ctx; w: (D, D) bf16 pre-transposed; res: (TM, D) f32.
    proj = jax.lax.dot_general(
        x_ref[...], w_ref[...],
        dimension_numbers=(((1,), (0,)), ((), ())),
        preferred_element_type=jnp.float32,
    ) + b_ref[...]
    z = res_ref[...] + proj
    mean = jnp.mean(z, axis=-1, keepdims=True)
    var = jnp.mean(jnp.square(z - mean), axis=-1, keepdims=True)
    o_ref[...] = (z - mean) * jax.lax.rsqrt(var + eps) * g_ref[...] + bt_ref[...]


def _ffn_add_ln_kernel(x_ref, w1_ref, b1_ref, w2_ref, b2_ref, g_ref, bt_ref,
                       o_ref, *, eps):
    # linear1 + ReLU + linear2 + residual + LayerNorm fused.
    # w1: (D, F) bf16, w2: (F, D) bf16, both pre-transposed (K, N).
    # TODO(synk): add an F-tiled accumulator path once 2*D*F*2 bytes approaches
    #             the VMEM budget (needed on v7x at roughly half of v5e/v6e's D*F).
    xb = x_ref[...].astype(jnp.bfloat16)
    h = jax.lax.dot_general(
        xb, w1_ref[...],
        dimension_numbers=(((1,), (0,)), ((), ())),
        preferred_element_type=jnp.float32,
    ) + b1_ref[...]
    h = jnp.maximum(h, 0.0)
    f = jax.lax.dot_general(
        h.astype(jnp.bfloat16), w2_ref[...],
        dimension_numbers=(((1,), (0,)), ((), ())),
        preferred_element_type=jnp.float32,
    ) + b2_ref[...]
    z = x_ref[...] + f
    mean = jnp.mean(z, axis=-1, keepdims=True)
    var = jnp.mean(jnp.square(z - mean), axis=-1, keepdims=True)
    o_ref[...] = (z - mean) * jax.lax.rsqrt(var + eps) * g_ref[...] + bt_ref[...]


# ----------------------------------------------------------------------------
# pallas_call wrappers
# ----------------------------------------------------------------------------
# TODO(synk): mark constant-index_map operands (weights/biases/gamma/beta) as
# single-buffered via pipeline_mode=pl.Buffered(1) once verified on the target
# jax version; omitted here to keep compilation robust.

def qkv_proj(x2d, wqkv_t_bf16, bqkv, n_heads):
    M, D = x2d.shape
    N = wqkv_t_bf16.shape[1]  # 3 * D
    scale = 1.0 / math.sqrt(D // n_heads)
    tm = _row_tile(M, _ROW_CAP)
    return pl.pallas_call(
        functools.partial(_qkv_kernel, d_model=D, q_scale=scale),
        out_shape=tuple(jax.ShapeDtypeStruct((M, D), jnp.bfloat16) for _ in range(3)),
        grid=(pl.cdiv(M, tm),),
        in_specs=[
            pl.BlockSpec((tm, D), lambda i: (i, 0)),   # activation tile
            pl.BlockSpec((D, N), lambda i: (0, 0)),    # weight: VMEM-resident
            pl.BlockSpec((1, N), lambda i: (0, 0)),
        ],
        out_specs=tuple(pl.BlockSpec((tm, D), lambda i: (i, 0)) for _ in range(3)),
        compiler_params=pltpu.CompilerParams(
            dimension_semantics=("parallel",),
            vmem_limit_bytes=_VMEM_LIMIT),
        cost_estimate=pl.CostEstimate(
            flops=2 * M * D * N,
            transcendentals=0,
            bytes_accessed=M * D * 4 + D * N * 2 + 3 * M * D * 2),
    )(x2d, wqkv_t_bf16, bqkv.reshape(1, N))


def attention(q, k, v, mask_i8, n_heads, *, return_weights=True):
    B, Lq, D = q.shape
    Lk = k.shape[1]
    dk = D // n_heads

    out_shapes = [jax.ShapeDtypeStruct((B, Lq, D), jnp.bfloat16)]
    out_specs = [pl.BlockSpec((1, Lq, D), lambda b: (b, 0, 0))]
    bytes_accessed = (3 * B * Lk * D * 2 + B * Lq * Lk * 1 + B * Lq * D * 2)
    if return_weights:
        out_shapes.append(jax.ShapeDtypeStruct((B, n_heads, Lq, Lk), jnp.float32))
        out_specs.append(pl.BlockSpec((1, n_heads, Lq, Lk), lambda b: (b, 0, 0, 0)))
        bytes_accessed += B * n_heads * Lq * Lk * 4

    outs = pl.pallas_call(
        functools.partial(_attn_kernel, n_heads=n_heads),
        out_shape=tuple(out_shapes),
        grid=(B,),
        in_specs=[
            pl.BlockSpec((1, Lq, D), lambda b: (b, 0, 0)),
            pl.BlockSpec((1, Lk, D), lambda b: (b, 0, 0)),
            pl.BlockSpec((1, Lk, D), lambda b: (b, 0, 0)),
            pl.BlockSpec((1, Lq, Lk), lambda b: (b, 0, 0)),
        ],
        out_specs=tuple(out_specs),
        compiler_params=pltpu.CompilerParams(
            dimension_semantics=("parallel",),
            vmem_limit_bytes=_VMEM_LIMIT),
        cost_estimate=pl.CostEstimate(
            flops=4 * B * n_heads * Lq * Lk * dk,
            transcendentals=B * n_heads * Lq * Lk,
            bytes_accessed=bytes_accessed),
    )(q, k, v, mask_i8)
    if return_weights:
        return outs[0], outs[1]
    return outs[0], None


def proj_add_ln(ctx2d, wo_t_bf16, bo, res2d, gamma, beta, eps):
    M, D = ctx2d.shape
    tm = _row_tile(M, _ROW_CAP)
    return pl.pallas_call(
        functools.partial(_proj_add_ln_kernel, eps=eps),
        out_shape=jax.ShapeDtypeStruct((M, D), jnp.float32),
        grid=(pl.cdiv(M, tm),),
        in_specs=[
            pl.BlockSpec((tm, D), lambda i: (i, 0)),   # bf16 ctx
            pl.BlockSpec((D, D), lambda i: (0, 0)),    # pre-transposed weight
            pl.BlockSpec((1, D), lambda i: (0, 0)),
            pl.BlockSpec((tm, D), lambda i: (i, 0)),   # f32 residual
            pl.BlockSpec((1, D), lambda i: (0, 0)),
            pl.BlockSpec((1, D), lambda i: (0, 0)),
        ],
        out_specs=pl.BlockSpec((tm, D), lambda i: (i, 0)),
        compiler_params=pltpu.CompilerParams(
            dimension_semantics=("parallel",),
            vmem_limit_bytes=_VMEM_LIMIT),
        cost_estimate=pl.CostEstimate(
            flops=2 * M * D * D,
            transcendentals=0,
            bytes_accessed=M * D * 2 + D * D * 2 + 2 * M * D * 4),
    )(ctx2d, wo_t_bf16, bo.reshape(1, D), res2d,
      gamma.reshape(1, D), beta.reshape(1, D))


def ffn_add_ln(x2d, w1_t_bf16, b1, w2_t_bf16, b2, gamma, beta, eps):
    M, D = x2d.shape
    F = w1_t_bf16.shape[1]
    tm = _row_tile(M, _FFN_ROW_CAP)
    return pl.pallas_call(
        functools.partial(_ffn_add_ln_kernel, eps=eps),
        out_shape=jax.ShapeDtypeStruct((M, D), jnp.float32),
        grid=(pl.cdiv(M, tm),),
        in_specs=[
            pl.BlockSpec((tm, D), lambda i: (i, 0)),
            pl.BlockSpec((D, F), lambda i: (0, 0)),    # pre-transposed (K, N)
            pl.BlockSpec((1, F), lambda i: (0, 0)),
            pl.BlockSpec((F, D), lambda i: (0, 0)),    # pre-transposed (K, N)
            pl.BlockSpec((1, D), lambda i: (0, 0)),
            pl.BlockSpec((1, D), lambda i: (0, 0)),
            pl.BlockSpec((1, D), lambda i: (0, 0)),
        ],
        out_specs=pl.BlockSpec((tm, D), lambda i: (i, 0)),
        compiler_params=pltpu.CompilerParams(
            dimension_semantics=("parallel",),
            vmem_limit_bytes=_VMEM_LIMIT),
        cost_estimate=pl.CostEstimate(
            flops=4 * M * D * F,
            transcendentals=0,
            bytes_accessed=2 * M * D * 4 + 2 * D * F * 2),
    )(x2d, w1_t_bf16, b1.reshape(1, F), w2_t_bf16, b2.reshape(1, D),
      gamma.reshape(1, D), beta.reshape(1, D))


# ----------------------------------------------------------------------------
# EncoderLayer forward (plain-JAX glue around the Pallas kernels)
# ----------------------------------------------------------------------------

def encoder_layer_forward(params, x, attn_mask, *, n_heads, eps=1e-6,
                          return_attn_weights=True):
    """x: (B, L, D) f32; attn_mask: (B, L, L) bool (True = masked)."""
    B, L, D = x.shape
    M = B * L
    x2d = x.reshape(M, D)

    # fused WQ/WK/WV projection; q is pre-scaled by 1/sqrt(d_k); bf16 outputs
    q2d, k2d, v2d = qkv_proj(x2d, params["wqkv_t"], params["bqkv"], n_heads)
    q = q2d.reshape(B, L, D)
    k = k2d.reshape(B, L, D)
    v = v2d.reshape(B, L, D)

    # scaled-dot-product attention (all heads in-kernel), head-interleaved output
    ctx, attn_w = attention(q, k, v, attn_mask.astype(jnp.int8), n_heads,
                            return_weights=return_attn_weights)

    # dropout1 == identity (eval); output projection + residual + LayerNorm1
    x1 = proj_add_ln(ctx.reshape(M, D), params["wo_t"], params["bo"],
                     x2d, params["ln1_g"], params["ln1_b"], eps)

    # dropout2 == identity (eval); FFN + residual + LayerNorm2
    out = ffn_add_ln(x1, params["ffn_w1_t"], params["ffn_b1"],
                     params["ffn_w2_t"], params["ffn_b2"],
                     params["ln2_g"], params["ln2_b"], eps)
    return out.reshape(B, L, D), attn_w


# ----------------------------------------------------------------------------
# Deterministic parameter construction
# ----------------------------------------------------------------------------

def init_encoder_layer_params(key, d_model, d_ff):
    """All matmul weights are stored pre-transposed to (in, out) = torch W.T,
    cast once to bf16 (MXU-native); f32 accumulation happens in the kernels."""
    ks = jax.random.split(key, 6)
    s = 0.02
    # torch nn.Linear layout is (out, in); generate that, then transpose once.
    wq = jax.random.normal(ks[0], (d_model, d_model), jnp.float32) * s
    wk = jax.random.normal(ks[1], (d_model, d_model), jnp.float32) * s
    wv = jax.random.normal(ks[2], (d_model, d_model), jnp.float32) * s
    wo = jax.random.normal(ks[3], (d_model, d_model), jnp.float32) * s
    w1 = jax.random.normal(ks[4], (d_ff, d_model), jnp.float32) * s
    w2 = jax.random.normal(ks[5], (d_model, d_ff), jnp.float32) * s
    # TODO(synk): optional fp8 weight path for v7x not implemented (bf16 only).
    return {
        "wqkv_t": jnp.concatenate([wq.T, wk.T, wv.T], axis=1).astype(jnp.bfloat16),  # (D, 3D)
        "bqkv": jnp.zeros((3 * d_model,), jnp.float32),
        "wo_t": wo.T.astype(jnp.bfloat16),               # (D, D)
        "bo": jnp.zeros((d_model,), jnp.float32),
        "ln1_g": jnp.ones((d_model,), jnp.float32),
        "ln1_b": jnp.zeros((d_model,), jnp.float32),
        "ffn_w1_t": w1.T.astype(jnp.bfloat16),            # (D, F)
        "ffn_b1": jnp.zeros((d_ff,), jnp.float32),
        "ffn_w2_t": w2.T.astype(jnp.bfloat16),            # (F, D)
        "ffn_b2": jnp.zeros((d_model,), jnp.float32),
        "ln2_g": jnp.ones((d_model,), jnp.float32),
        "ln2_b": jnp.zeros((d_model,), jnp.float32),
    }


# ----------------------------------------------------------------------------
# Demo
# ----------------------------------------------------------------------------

if __name__ == "__main__":
    d_model, n_heads, d_ff = 32, 4, 64
    B, L = 2, 8
    pad_len = 2

    root = jax.random.PRNGKey(0)
    k_p, k_x = jax.random.split(root, 2)

    params = init_encoder_layer_params(k_p, d_model, d_ff)
    x = jax.random.normal(k_x, (B, L, d_model), jnp.float32)

    # encoder pad mask: last `pad_len` key positions are padding -> masked keys
    key_is_pad = jnp.zeros((B, L), jnp.bool_).at[:, L - pad_len:].set(True)
    attn_mask = jnp.broadcast_to(key_is_pad[:, None, :], (B, L, L))

    fwd = jax.jit(functools.partial(encoder_layer_forward, n_heads=n_heads))
    out, attn_w = fwd(params, x, attn_mask)
    jax.block_until_ready((out, attn_w))

    assert out.shape == (B, L, d_model)
    assert attn_w.shape == (B, n_heads, L, L)
    assert bool(jnp.all(jnp.isfinite(out)))
    assert bool(jnp.all(jnp.isfinite(attn_w)))
    print("KERNEL_OK")
</pallas_src>

<mosaic_0001>
module attributes {stable_mosaic.version = 11 : i64} {
  func.func @_qkv_kernel(%arg0: i32, %arg1: memref<16x32xf32, #tpu.memory_space<vmem>>, %arg2: memref<32x96xbf16, #tpu.memory_space<vmem>>, %arg3: memref<1x96xf32, #tpu.memory_space<vmem>>, %arg4: memref<16x32xbf16, #tpu.memory_space<vmem>>, %arg5: memref<16x32xbf16, #tpu.memory_space<vmem>>, %arg6: memref<16x32xbf16, #tpu.memory_space<vmem>>) attributes {dimension_semantics = [#tpu.dimension_semantics<parallel>], iteration_bounds = array<i64: 1>, scalar_prefetch = 0 : i64, scratch_operands = 0 : i64, tpu.core_type = #tpu.core_type<tc>, window_params = [{transform_indices = @transform_0, window_bounds = array<i64: 16, 32>}, {pipeline_mode = #tpu.pipeline_mode<synchronous>, transform_indices = @transform_1, window_bounds = array<i64: 32, 96>}, {pipeline_mode = #tpu.pipeline_mode<synchronous>, transform_indices = @transform_2, window_bounds = array<i64: 1, 96>}, {transform_indices = @transform_3, window_bounds = array<i64: 16, 32>}, {transform_indices = @transform_4, window_bounds = array<i64: 16, 32>}, {transform_indices = @transform_5, window_bounds = array<i64: 16, 32>}]} {
    %c0 = arith.constant 0 : index
    %c0_0 = arith.constant 0 : index
    %0 = vector.load %arg1[%c0, %c0_0] : memref<16x32xf32, #tpu.memory_space<vmem>>, vector<16x32xf32>
    %1 = arith.truncf %0 : vector<16x32xf32> to vector<16x32xbf16>
    %c0_1 = arith.constant 0 : index
    %c0_2 = arith.constant 0 : index
    %2 = vector.load %arg2[%c0_1, %c0_2] : memref<32x96xbf16, #tpu.memory_space<vmem>>, vector<32x96xbf16>
    %cst = arith.constant dense<0.000000e+00> : vector<16x96xf32>
    %3 = tpu.matmul %1, %2, %cst {dimension_numbers = #tpu.dot_dimension_numbers<[1], [0], [0], [1], [0, 0, 1, 1], [], []>} : vector<16x32xbf16>, vector<32x96xbf16>, vector<16x96xf32> -> vector<16x96xf32>
    %c0_3 = arith.constant 0 : index
    %c0_4 = arith.constant 0 : index
    %4 = vector.load %arg3[%c0_3, %c0_4] : memref<1x96xf32, #tpu.memory_space<vmem>>, vector<1x96xf32>
    %5 = vector.broadcast %4 : vector<1x96xf32> to vector<16x96xf32>
    %6 = arith.addf %3, %5 : vector<16x96xf32>
    %7 = vector.extract_strided_slice %6 {offsets = [0, 0], sizes = [16, 32], strides = [1, 1]} : vector<16x96xf32> to vector<16x32xf32>
    %cst_5 = arith.constant 0.353553385 : f32
    %8 = vector.broadcast %cst_5 : f32 to vector<16x32xf32>
    %9 = arith.mulf %7, %8 : vector<16x32xf32>
    %10 = arith.truncf %9 : vector<16x32xf32> to vector<16x32xbf16>
    %c0_6 = arith.constant 0 : index
    %c0_7 = arith.constant 0 : index
    %11 = vector.load %arg4[%c0_6, %c0_7] : memref<16x32xbf16, #tpu.memory_space<vmem>>, vector<16x32xbf16>
    tpu.vector_store %arg4[%c0_6, %c0_7], %10 {strides = array<i32>} : memref<16x32xbf16, #tpu.memory_space<vmem>>, vector<16x32xbf16>,
    %12 = vector.extract_strided_slice %6 {offsets = [0, 32], sizes = [16, 32], strides = [1, 1]} : vector<16x96xf32> to vector<16x32xf32>
    %13 = arith.truncf %12 : vector<16x32xf32> to vector<16x32xbf16>
    %c0_8 = arith.constant 0 : index
    %c0_9 = arith.constant 0 : index
    %14 = vector.load %arg5[%c0_8, %c0_9] : memref<16x32xbf16, #tpu.memory_space<vmem>>, vector<16x32xbf16>
    tpu.vector_store %arg5[%c0_8, %c0_9], %13 {strides = array<i32>} : memref<16x32xbf16, #tpu.memory_space<vmem>>, vector<16x32xbf16>,
    %15 = vector.extract_strided_slice %6 {offsets = [0, 64], sizes = [16, 32], strides = [1, 1]} : vector<16x96xf32> to vector<16x32xf32>
    %16 = arith.truncf %15 : vector<16x32xf32> to vector<16x32xbf16>
    %c0_10 = arith.constant 0 : index
    %c0_11 = arith.constant 0 : index
    %17 = vector.load %arg6[%c0_10, %c0_11] : memref<16x32xbf16, #tpu.memory_space<vmem>>, vector<16x32xbf16>
    tpu.vector_store %arg6[%c0_10, %c0_11], %16 {strides = array<i32>} : memref<16x32xbf16, #tpu.memory_space<vmem>>, vector<16x32xbf16>,
    return
  }
  func.func @transform_0(%arg0: i32) -> (i32, i32) {
    %c0_i32 = arith.constant 0 : i32
    %c0_i32_0 = arith.constant 0 : i32
    return %arg0, %c0_i32 : i32, i32
  }
  func.func @transform_1(%arg0: i32) -> (i32, i32) {
    %c0_i32 = arith.constant 0 : i32
    %c0_i32_0 = arith.constant 0 : i32
    %c0_i32_1 = arith.constant 0 : i32
    return %c0_i32, %c0_i32_0 : i32, i32
  }
  func.func @transform_2(%arg0: i32) -> (i32, i32) {
    %c0_i32 = arith.constant 0 : i32
    %c0_i32_0 = arith.constant 0 : i32
    %c0_i32_1 = arith.constant 0 : i32
    return %c0_i32, %c0_i32_0 : i32, i32
  }
  func.func @transform_3(%arg0: i32) -> (i32, i32) {
    %c0_i32 = arith.constant 0 : i32
    %c0_i32_0 = arith.constant 0 : i32
    return %arg0, %c0_i32 : i32, i32
  }
  func.func @transform_4(%arg0: i32) -> (i32, i32) {
    %c0_i32 = arith.constant 0 : i32
    %c0_i32_0 = arith.constant 0 : i32
    return %arg0, %c0_i32 : i32, i32
  }
  func.func @transform_5(%arg0: i32) -> (i32, i32) {
    %c0_i32 = arith.constant 0 : i32
    %c0_i32_0 = arith.constant 0 : i32
    return %arg0, %c0_i32 : i32, i32
  }
}

module attributes {stable_mosaic.version = 11 : i64} {
  func.func @_proj_add_ln_kernel(%arg0: i32, %arg1: memref<16x32xbf16, #tpu.memory_space<vmem>>, %arg2: memref<32x32xbf16, #tpu.memory_space<vmem>>, %arg3: memref<1x32xf32, #tpu.memory_space<vmem>>, %arg4: memref<16x32xf32, #tpu.memory_space<vmem>>, %arg5: memref<1x32xf32, #tpu.memory_space<vmem>>, %arg6: memref<1x32xf32, #tpu.memory_space<vmem>>, %arg7: memref<16x32xf32, #tpu.memory_space<vmem>>) attributes {dimension_semantics = [#tpu.dimension_semantics<parallel>], iteration_bounds = array<i64: 1>, scalar_prefetch = 0 : i64, scratch_operands = 0 : i64, tpu.core_type = #tpu.core_type<tc>, window_params = [{transform_indices = @transform_0, window_bounds = array<i64: 16, 32>}, {pipeline_mode = #tpu.pipeline_mode<synchronous>, transform_indices = @transform_1, window_bounds = array<i64: 32, 32>}, {pipeline_mode = #tpu.pipeline_mode<synchronous>, transform_indices = @transform_2, window_bounds = array<i64: 1, 32>}, {transform_indices = @transform_3, window_bounds = array<i64: 16, 32>}, {pipeline_mode = #tpu.pipeline_mode<synchronous>, transform_indices = @transform_4, window_bounds = array<i64: 1, 32>}, {pipeline_mode = #tpu.pipeline_mode<synchronous>, transform_indices = @transform_5, window_bounds = array<i64: 1, 32>}, {transform_indices = @transform_6, window_bounds = array<i64: 16, 32>}]} {
    %c0 = arith.constant 0 : index
    %c0_0 = arith.constant 0 : index
    %0 = vector.load %arg1[%c0, %c0_0] : memref<16x32xbf16, #tpu.memory_space<vmem>>, vector<16x32xbf16>
    %c0_1 = arith.constant 0 : index
    %c0_2 = arith.constant 0 : index
    %1 = vector.load %arg2[%c0_1, %c0_2] : memref<32x32xbf16, #tpu.memory_space<vmem>>, vector<32x32xbf16>
    %cst = arith.constant dense<0.000000e+00> : vector<16x32xf32>
    %2 = tpu.matmul %0, %1, %cst {dimension_numbers = #tpu.dot_dimension_numbers<[1], [0], [0], [1], [0, 0, 1, 1], [], []>} : vector<16x32xbf16>, vector<32x32xbf16>, vector<16x32xf32> -> vector<16x32xf32>
    %c0_3 = arith.constant 0 : index
    %c0_4 = arith.constant 0 : index
    %3 = vector.load %arg3[%c0_3, %c0_4] : memref<1x32xf32, #tpu.memory_space<vmem>>, vector<1x32xf32>
    %4 = vector.broadcast %3 : vector<1x32xf32> to vector<16x32xf32>
    %5 = arith.addf %2, %4 : vector<16x32xf32>
    %c0_5 = arith.constant 0 : index
    %c0_6 = arith.constant 0 : index
    %6 = vector.load %arg4[%c0_5, %c0_6] : memref<16x32xf32, #tpu.memory_space<vmem>>, vector<16x32xf32>
    %7 = arith.addf %6, %5 : vector<16x32xf32>
    %cst_7 = arith.constant dense<0.000000e+00> : vector<16xf32>
    %8 = vector.multi_reduction <add>, %7, %cst_7 [1] : vector<16x32xf32> to vector<16xf32>
    %9 = vector.shape_cast %8 : vector<16xf32> to vector<16x1xf32>
    %cst_8 = arith.constant 3.200000e+01 : f32
    %10 = vector.broadcast %cst_8 : f32 to vector<16x1xf32>
    %11 = arith.divf %9, %10 : vector<16x1xf32>
    %12 = vector.broadcast %11 : vector<16x1xf32> to vector<16x32xf32>
    %13 = arith.subf %7, %12 : vector<16x32xf32>
    %14 = arith.mulf %13, %13 : vector<16x32xf32>
    %cst_9 = arith.constant dense<0.000000e+00> : vector<16xf32>
    %15 = vector.multi_reduction <add>, %14, %cst_9 [1] : vector<16x32xf32> to vector<16xf32>
    %16 = vector.shape_cast %15 : vector<16xf32> to vector<16x1xf32>
    %cst_10 = arith.constant 3.200000e+01 : f32
    %17 = vector.broadcast %cst_10 : f32 to vector<16x1xf32>
    %18 = arith.divf %16, %17 : vector<16x1xf32>
    %19 = vector.broadcast %11 : vector<16x1xf32> to vector<16x32xf32>
    %20 = arith.subf %7, %19 : vector<16x32xf32>
    %cst_11 = arith.constant 9.99999997E-7 : f32
    %21 = vector.broadcast %cst_11 : f32 to vector<16x1xf32>
    %22 = arith.addf %18, %21 : vector<16x1xf32>
    %23 = math.rsqrt %22 : vector<16x1xf32>
    %24 = vector.broadcast %23 : vector<16x1xf32> to vector<16x32xf32>
    %25 = arith.mulf %20, %24 : vector<16x32xf32>
    %c0_12 = arith.constant 0 : index
    %c0_13 = arith.constant 0 : index
    %26 = vector.load %arg5[%c0_12, %c0_13] : memref<1x32xf32, #tpu.memory_space<vmem>>, vector<1x32xf32>
    %27 = vector.broadcast %26 : vector<1x32xf32> to vector<16x32xf32>
    %28 = arith.mulf %25, %27 : vector<16x32xf32>
    %c0_14 = arith.constant 0 : index
    %c0_15 = arith.constant 0 : index
    %29 = vector.load %arg6[%c0_14, %c0_15] : memref<1x32xf32, #tpu.memory_space<vmem>>, vector<1x32xf32>
    %30 = vector.broadcast %29 : vector<1x32xf32> to vector<16x32xf32>
    %31 = arith.addf %28, %30 : vector<16x32xf32>
    %c0_16 = arith.constant 0 : index
    %c0_17 = arith.constant 0 : index
    %32 = vector.load %arg7[%c0_16, %c0_17] : memref<16x32xf32, #tpu.memory_space<vmem>>, vector<16x32xf32>
    tpu.vector_store %arg7[%c0_16, %c0_17], %31 {strides = array<i32>} : memref<16x32xf32, #tpu.memory_space<vmem>>, vector<16x32xf32>,
    return
  }
  func.func @transform_0(%arg0: i32) -> (i32, i32) {
    %c0_i32 = arith.constant 0 : i32
    %c0_i32_0 = arith.constant 0 : i32
    return %arg0, %c0_i32 : i32, i32
  }
  func.func @transform_1(%arg0: i32) -> (i32, i32) {
    %c0_i32 = arith.constant 0 : i32
    %c0_i32_0 = arith.constant 0 : i32
    %c0_i32_1 = arith.constant 0 : i32
    return %c0_i32, %c0_i32_0 : i32, i32
  }
  func.func @transform_2(%arg0: i32) -> (i32, i32) {
    %c0_i32 = arith.constant 0 : i32
    %c0_i32_0 = arith.constant 0 : i32
    %c0_i32_1 = arith.constant 0 : i32
    return %c0_i32, %c0_i32_0 : i32, i32
  }
  func.func @transform_3(%arg0: i32) -> (i32, i32) {
    %c0_i32 = arith.constant 0 : i32
    %c0_i32_0 = arith.constant 0 : i32
    return %arg0, %c0_i32 : i32, i32
  }
  func.func @transform_4(%arg0: i32) -> (i32, i32) {
    %c0_i32 = arith.constant 0 : i32
    %c0_i32_0 = arith.constant 0 : i32
    %c0_i32_1 = arith.constant 0 : i32
    return %c0_i32, %c0_i32_0 : i32, i32
  }
  func.func @transform_5(%arg0: i32) -> (i32, i32) {
    %c0_i32 = arith.constant 0 : i32
    %c0_i32_0 = arith.constant 0 : i32
    %c0_i32_1 = arith.constant 0 : i32
    return %c0_i32, %c0_i32_0 : i32, i32
  }
  func.func @transform_6(%arg0: i32) -> (i32, i32) {
    %c0_i32 = arith.constant 0 : i32
    %c0_i32_0 = arith.constant 0 : i32
    return %arg0, %c0_i32 : i32, i32
  }
}

module attributes {stable_mosaic.version = 11 : i64} {
  func.func @_attn_kernel(%arg0: i32, %arg1: memref<1x8x32xbf16, #tpu.memory_space<vmem>>, %arg2: memref<1x8x32xbf16, #tpu.memory_space<vmem>>, %arg3: memref<1x8x32xbf16, #tpu.memory_space<vmem>>, %arg4: memref<1x8x8xi8, #tpu.memory_space<vmem>>, %arg5: memref<1x8x32xbf16, #tpu.memory_space<vmem>>, %arg6: memref<1x4x8x8xf32, #tpu.memory_space<vmem>>) attributes {dimension_semantics = [#tpu.dimension_semantics<parallel>], iteration_bounds = array<i64: 2>, scalar_prefetch = 0 : i64, scratch_operands = 0 : i64, tpu.core_type = #tpu.core_type<tc>, window_params = [{transform_indices = @transform_0, window_bounds = array<i64: 1, 8, 32>}, {transform_indices = @transform_1, window_bounds = array<i64: 1, 8, 32>}, {transform_indices = @transform_2, window_bounds = array<i64: 1, 8, 32>}, {transform_indices = @transform_3, window_bounds = array<i64: 1, 8, 8>}, {transform_indices = @transform_4, window_bounds = array<i64: 1, 8, 32>}, {transform_indices = @transform_5, window_bounds = array<i64: 1, 4, 8, 8>}]} {
    %c0 = arith.constant 0 : index
    %c0_0 = arith.constant 0 : index
    %c0_1 = arith.constant 0 : index
    %0 = vector.load %arg1[%c0, %c0_0, %c0_1] : memref<1x8x32xbf16, #tpu.memory_space<vmem>>, vector<1x8x32xbf16>
    %1 = vector.shape_cast %0 : vector<1x8x32xbf16> to vector<8x32xbf16>
    %2 = vector.shape_cast %1 : vector<8x32xbf16> to vector<8x4x8xbf16>
    %c0_2 = arith.constant 0 : index
    %c0_3 = arith.constant 0 : index
    %c0_4 = arith.constant 0 : index
    %3 = vector.load %arg2[%c0_2, %c0_3, %c0_4] : memref<1x8x32xbf16, #tpu.memory_space<vmem>>, vector<1x8x32xbf16>
    %4 = vector.shape_cast %3 : vector<1x8x32xbf16> to vector<8x32xbf16>
    %5 = vector.shape_cast %4 : vector<8x32xbf16> to vector<8x4x8xbf16>
    %c0_5 = arith.constant 0 : index
    %c0_6 = arith.constant 0 : index
    %c0_7 = arith.constant 0 : index
    %6 = vector.load %arg3[%c0_5, %c0_6, %c0_7] : memref<1x8x32xbf16, #tpu.memory_space<vmem>>, vector<1x8x32xbf16>
    %7 = vector.shape_cast %6 : vector<1x8x32xbf16> to vector<8x32xbf16>
    %8 = vector.shape_cast %7 : vector<8x32xbf16> to vector<8x4x8xbf16>
    "tpu.trace_start"() <{level = 10 : i32, message = "qhd,khd->hqk"}> : () -> ()
    %cst = arith.constant dense<0.000000e+00> : vector<4x8x8xf32>
    %9 = tpu.matmul %2, %5, %cst {dimension_numbers = #tpu.dot_dimension_numbers<[2], [2], [0], [0], [0, 1, 0, 0, 1, 0], [1], [1]>} : vector<8x4x8xbf16>, vector<8x4x8xbf16>, vector<4x8x8xf32> -> vector<4x8x8xf32>
    "tpu.trace_stop"() : () -> ()
    %c0_8 = arith.constant 0 : index
    %c0_9 = arith.constant 0 : index
    %c0_10 = arith.constant 0 : index
    %10 = vector.load %arg4[%c0_8, %c0_9, %c0_10] : memref<1x8x8xi8, #tpu.memory_space<vmem>>, vector<1x8x8xi8>
    %11 = vector.shape_cast %10 : vector<1x8x8xi8> to vector<8x8xi8>
    %c0_i8 = arith.constant 0 : i8
    %12 = vector.broadcast %c0_i8 : i8 to vector<8x8xi8>
    %13 = arith.cmpi ne, %11, %12 : vector<8x8xi8>
    %14 = vector.shape_cast %13 : vector<8x8xi1> to vector<1x8x8xi1>
    %cst_11 = arith.constant -1.000000e+09 : f32
    %15 = vector.shape_cast %14 : vector<1x8x8xi1> to vector<1x8x8xi1>
    %16 = vector.broadcast %15 : vector<1x8x8xi1> to vector<4x8x8xi1>
    %17 = vector.broadcast %cst_11 : f32 to vector<4x8x8xf32>
    %18 = arith.select %16, %17, %9 : vector<4x8x8xi1>, vector<4x8x8xf32>
    %cst_12 = arith.constant dense<0xFF800000> : vector<4x8xf32>
    %19 = vector.multi_reduction <maximumf>, %18, %cst_12 [2] : vector<4x8x8xf32> to vector<4x8xf32>
    %20 = vector.shape_cast %19 : vector<4x8xf32> to vector<4x8x1xf32>
    %21 = vector.broadcast %20 : vector<4x8x1xf32> to vector<4x8x8xf32>
    %22 = arith.subf %18, %21 : vector<4x8x8xf32>
    %23 = math.exp %22 : vector<4x8x8xf32>
    %cst_13 = arith.constant dense<0.000000e+00> : vector<4x8xf32>
    %24 = vector.multi_reduction <add>, %23, %cst_13 [2] : vector<4x8x8xf32> to vector<4x8xf32>
    %25 = vector.shape_cast %24 : vector<4x8xf32> to vector<4x8x1xf32>
    %26 = tpu.reciprocal %25 {approx = true} : vector<4x8x1xf32> -> vector<4x8x1xf32>
    %27 = vector.broadcast %26 : vector<4x8x1xf32> to vector<4x8x8xf32>
    %28 = arith.mulf %23, %27 : vector<4x8x8xf32>
    %29 = arith.truncf %28 : vector<4x8x8xf32> to vector<4x8x8xbf16>
    "tpu.trace_start"() <{level = 10 : i32, message = "hqk,khd->qhd"}> : () -> ()
    %cst_14 = arith.constant dense<0.000000e+00> : vector<4x8x8xf32>
    %30 = tpu.matmul %8, %29, %cst_14 {dimension_numbers = #tpu.dot_dimension_numbers<[0], [2], [2], [1], [0, 1, 0, 2, 1, 1], [1], [0]>} : vector<8x4x8xbf16>, vector<4x8x8xbf16>, vector<4x8x8xf32> -> vector<4x8x8xf32>
    %31 = tpu.transpose %30, [2, 0, 1] : vector<4x8x8xf32> -> vector<8x4x8xf32>
    "tpu.trace_stop"() : () -> ()
    %32 = vector.shape_cast %31 : vector<8x4x8xf32> to vector<8x32xf32>
    %33 = arith.truncf %32 : vector<8x32xf32> to vector<8x32xbf16>
    %c0_15 = arith.constant 0 : index
    %c0_16 = arith.constant 0 : index
    %c0_17 = arith.constant 0 : index
    %34 = vector.load %arg5[%c0_15, %c0_16, %c0_17] : memref<1x8x32xbf16, #tpu.memory_space<vmem>>, vector<1x8x32xbf16>
    %35 = vector.shape_cast %34 : vector<1x8x32xbf16> to vector<8x32xbf16>
    %36 = vector.shape_cast %33 : vector<8x32xbf16> to vector<1x8x32xbf16>
    tpu.vector_store %arg5[%c0_15, %c0_16, %c0_17], %36 {strides = array<i32>} : memref<1x8x32xbf16, #tpu.memory_space<vmem>>, vector<1x8x32xbf16>,
    %c0_18 = arith.constant 0 : index
    %c0_19 = arith.constant 0 : index
    %c0_20 = arith.constant 0 : index
    %c0_21 = arith.constant 0 : index
    %37 = vector.load %arg6[%c0_18, %c0_19, %c0_20, %c0_21] : memref<1x4x8x8xf32, #tpu.memory_space<vmem>>, vector<1x4x8x8xf32>
    %38 = vector.shape_cast %37 : vector<1x4x8x8xf32> to vector<4x8x8xf32>
    %39 = vector.shape_cast %28 : vector<4x8x8xf32> to vector<1x4x8x8xf32>
    tpu.vector_store %arg6[%c0_18, %c0_19, %c0_20, %c0_21], %39 {strides = array<i32>} : memref<1x4x8x8xf32, #tpu.memory_space<vmem>>, vector<1x4x8x8xf32>,
    return
  }
  func.func @transform_0(%arg0: i32) -> (i32, i32, i32) {
    %c0_i32 = arith.constant 0 : i32
    %c0_i32_0 = arith.constant 0 : i32
    %c0_i32_1 = arith.constant 0 : i32
    return %arg0, %c0_i32, %c0_i32_0 : i32, i32, i32
  }
  func.func @transform_1(%arg0: i32) -> (i32, i32, i32) {
    %c0_i32 = arith.constant 0 : i32
    %c0_i32_0 = arith.constant 0 : i32
    %c0_i32_1 = arith.constant 0 : i32
    return %arg0, %c0_i32, %c0_i32_0 : i32, i32, i32
  }
  func.func @transform_2(%arg0: i32) -> (i32, i32, i32) {
    %c0_i32 = arith.constant 0 : i32
    %c0_i32_0 = arith.constant 0 : i32
    %c0_i32_1 = arith.constant 0 : i32
    return %arg0, %c0_i32, %c0_i32_0 : i32, i32, i32
  }
  func.func @transform_3(%arg0: i32) -> (i32, i32, i32) {
    %c0_i32 = arith.constant 0 : i32
    %c0_i32_0 = arith.constant 0 : i32
    %c0_i32_1 = arith.constant 0 : i32
    return %arg0, %c0_i32, %c0_i32_0 : i32, i32, i32
  }
  func.func @transform_4(%arg0: i32) -> (i32, i32, i32) {
    %c0_i32 = arith.constant 0 : i32
    %c0_i32_0 = arith.constant 0 : i32
    %c0_i32_1 = arith.constant 0 : i32
    return %arg0, %c0_i32, %c0_i32_0 : i32, i32, i32
  }
  func.func @transform_5(%arg0: i32) -> (i32, i32, i32, i32) {
    %c0_i32 = arith.constant 0 : i32
    %c0_i32_0 = arith.constant 0 : i32
    %c0_i32_1 = arith.constant 0 : i32
    %c0_i32_2 = arith.constant 0 : i32
    return %arg0, %c0_i32, %c0_i32_0, %c0_i32_1 : i32, i32, i32, i32
  }
}

module attributes {stable_mosaic.version = 11 : i64} {
  func.func @_ffn_add_ln_kernel(%arg0: i32, %arg1: memref<16x32xf32, #tpu.memory_space<vmem>>, %arg2: memref<32x64xbf16, #tpu.memory_space<vmem>>, %arg3: memref<1x64xf32, #tpu.memory_space<vmem>>, %arg4: memref<64x32xbf16, #tpu.memory_space<vmem>>, %arg5: memref<1x32xf32, #tpu.memory_space<vmem>>, %arg6: memref<1x32xf32, #tpu.memory_space<vmem>>, %arg7: memref<1x32xf32, #tpu.memory_space<vmem>>, %arg8: memref<16x32xf32, #tpu.memory_space<vmem>>) attributes {dimension_semantics = [#tpu.dimension_semantics<parallel>], iteration_bounds = array<i64: 1>, scalar_prefetch = 0 : i64, scratch_operands = 0 : i64, tpu.core_type = #tpu.core_type<tc>, window_params = [{transform_indices = @transform_0, window_bounds = array<i64: 16, 32>}, {pipeline_mode = #tpu.pipeline_mode<synchronous>, transform_indices = @transform_1, window_bounds = array<i64: 32, 64>}, {pipeline_mode = #tpu.pipeline_mode<synchronous>, transform_indices = @transform_2, window_bounds = array<i64: 1, 64>}, {pipeline_mode = #tpu.pipeline_mode<synchronous>, transform_indices = @transform_3, window_bounds = array<i64: 64, 32>}, {pipeline_mode = #tpu.pipeline_mode<synchronous>, transform_indices = @transform_4, window_bounds = array<i64: 1, 32>}, {pipeline_mode = #tpu.pipeline_mode<synchronous>, transform_indices = @transform_5, window_bounds = array<i64: 1, 32>}, {pipeline_mode = #tpu.pipeline_mode<synchronous>, transform_indices = @transform_6, window_bounds = array<i64: 1, 32>}, {transform_indices = @transform_7, window_bounds = array<i64: 16, 32>}]} {
    %c0 = arith.constant 0 : index
    %c0_0 = arith.constant 0 : index
    %0 = vector.load %arg1[%c0, %c0_0] : memref<16x32xf32, #tpu.memory_space<vmem>>, vector<16x32xf32>
    %1 = arith.truncf %0 : vector<16x32xf32> to vector<16x32xbf16>
    %c0_1 = arith.constant 0 : index
    %c0_2 = arith.constant 0 : index
    %2 = vector.load %arg2[%c0_1, %c0_2] : memref<32x64xbf16, #tpu.memory_space<vmem>>, vector<32x64xbf16>
    %cst = arith.constant dense<0.000000e+00> : vector<16x64xf32>
    %3 = tpu.matmul %1, %2, %cst {dimension_numbers = #tpu.dot_dimension_numbers<[1], [0], [0], [1], [0, 0, 1, 1], [], []>} : vector<16x32xbf16>, vector<32x64xbf16>, vector<16x64xf32> -> vector<16x64xf32>
    %c0_3 = arith.constant 0 : index
    %c0_4 = arith.constant 0 : index
    %4 = vector.load %arg3[%c0_3, %c0_4] : memref<1x64xf32, #tpu.memory_space<vmem>>, vector<1x64xf32>
    %5 = vector.broadcast %4 : vector<1x64xf32> to vector<16x64xf32>
    %6 = arith.addf %3, %5 : vector<16x64xf32>
    %cst_5 = arith.constant 0.000000e+00 : f32
    %7 = vector.broadcast %cst_5 : f32 to vector<16x64xf32>
    %8 = arith.maximumf %6, %7 : vector<16x64xf32>
    %9 = arith.truncf %8 : vector<16x64xf32> to vector<16x64xbf16>
    %c0_6 = arith.constant 0 : index
    %c0_7 = arith.constant 0 : index
    %10 = vector.load %arg4[%c0_6, %c0_7] : memref<64x32xbf16, #tpu.memory_space<vmem>>, vector<64x32xbf16>
    %cst_8 = arith.constant dense<0.000000e+00> : vector<16x32xf32>
    %11 = tpu.matmul %9, %10, %cst_8 {dimension_numbers = #tpu.dot_dimension_numbers<[1], [0], [0], [1], [0, 0, 1, 1], [], []>} : vector<16x64xbf16>, vector<64x32xbf16>, vector<16x32xf32> -> vector<16x32xf32>
    %c0_9 = arith.constant 0 : index
    %c0_10 = arith.constant 0 : index
    %12 = vector.load %arg5[%c0_9, %c0_10] : memref<1x32xf32, #tpu.memory_space<vmem>>, vector<1x32xf32>
    %13 = vector.broadcast %12 : vector<1x32xf32> to vector<16x32xf32>
    %14 = arith.addf %11, %13 : vector<16x32xf32>
    %c0_11 = arith.constant 0 : index
    %c0_12 = arith.constant 0 : index
    %15 = vector.load %arg1[%c0_11, %c0_12] : memref<16x32xf32, #tpu.memory_space<vmem>>, vector<16x32xf32>
    %16 = arith.addf %15, %14 : vector<16x32xf32>
    %cst_13 = arith.constant dense<0.000000e+00> : vector<16xf32>
    %17 = vector.multi_reduction <add>, %16, %cst_13 [1] : vector<16x32xf32> to vector<16xf32>
    %18 = vector.shape_cast %17 : vector<16xf32> to vector<16x1xf32>
    %cst_14 = arith.constant 3.200000e+01 : f32
    %19 = vector.broadcast %cst_14 : f32 to vector<16x1xf32>
    %20 = arith.divf %18, %19 : vector<16x1xf32>
    %21 = vector.broadcast %20 : vector<16x1xf32> to vector<16x32xf32>
    %22 = arith.subf %16, %21 : vector<16x32xf32>
    %23 = arith.mulf %22, %22 : vector<16x32xf32>
    %cst_15 = arith.constant dense<0.000000e+00> : vector<16xf32>
    %24 = vector.multi_reduction <add>, %23, %cst_15 [1] : vector<16x32xf32> to vector<16xf32>
    %25 = vector.shape_cast %24 : vector<16xf32> to vector<16x1xf32>
    %cst_16 = arith.constant 3.200000e+01 : f32
    %26 = vector.broadcast %cst_16 : f32 to vector<16x1xf32>
    %27 = arith.divf %25, %26 : vector<16x1xf32>
    %28 = vector.broadcast %20 : vector<16x1xf32> to vector<16x32xf32>
    %29 = arith.subf %16, %28 : vector<16x32xf32>
    %cst_17 = arith.constant 9.99999997E-7 : f32
    %30 = vector.broadcast %cst_17 : f32 to vector<16x1xf32>
    %31 = arith.addf %27, %30 : vector<16x1xf32>
    %32 = math.rsqrt %31 : vector<16x1xf32>
    %33 = vector.broadcast %32 : vector<16x1xf32> to vector<16x32xf32>
    %34 = arith.mulf %29, %33 : vector<16x32xf32>
    %c0_18 = arith.constant 0 : index
    %c0_19 = arith.constant 0 : index
    %35 = vector.load %arg6[%c0_18, %c0_19] : memref<1x32xf32, #tpu.memory_space<vmem>>, vector<1x32xf32>
    %36 = vector.broadcast %35 : vector<1x32xf32> to vector<16x32xf32>
    %37 = arith.mulf %34, %36 : vector<16x32xf32>
    %c0_20 = arith.constant 0 : index
    %c0_21 = arith.constant 0 : index
    %38 = vector.load %arg7[%c0_20, %c0_21] : memref<1x32xf32, #tpu.memory_space<vmem>>, vector<1x32xf32>
    %39 = vector.broadcast %38 : vector<1x32xf32> to vector<16x32xf32>
    %40 = arith.addf %37, %39 : vector<16x32xf32>
    %c0_22 = arith.constant 0 : index
    %c0_23 = arith.constant 0 : index
    %41 = vector.load %arg8[%c0_22, %c0_23] : memref<16x32xf32, #tpu.memory_space<vmem>>, vector<16x32xf32>
    tpu.vector_store %arg8[%c0_22, %c0_23], %40 {strides = array<i32>} : memref<16x32xf32, #tpu.memory_space<vmem>>, vector<16x32xf32>,
    return
  }
  func.func @transform_0(%arg0: i32) -> (i32, i32) {
    %c0_i32 = arith.constant 0 : i32
    %c0_i32_0 = arith.constant 0 : i32
    return %arg0, %c0_i32 : i32, i32
  }
  func.func @transform_1(%arg0: i32) -> (i32, i32) {
    %c0_i32 = arith.constant 0 : i32
    %c0_i32_0 = arith.constant 0 : i32
    %c0_i32_1 = arith.constant 0 : i32
    return %c0_i32, %c0_i32_0 : i32, i32
  }
  func.func @transform_2(%arg0: i32) -> (i32, i32) {
    %c0_i32 = arith.constant 0 : i32
    %c0_i32_0 = arith.constant 0 : i32
    %c0_i32_1 = arith.constant 0 : i32
    return %c0_i32, %c0_i32_0 : i32, i32
  }
  func.func @transform_3(%arg0: i32) -> (i32, i32) {
    %c0_i32 = arith.constant 0 : i32
    %c0_i32_0 = arith.constant 0 : i32
    %c0_i32_1 = arith.constant 0 : i32
    return %c0_i32, %c0_i32_0 : i32, i32
  }
  func.func @transform_4(%arg0: i32) -> (i32, i32) {
    %c0_i32 = arith.constant 0 : i32
    %c0_i32_0 = arith.constant 0 : i32
    %c0_i32_1 = arith.constant 0 : i32
    return %c0_i32, %c0_i32_0 : i32, i32
  }
  func.func @transform_5(%arg0: i32) -> (i32, i32) {
    %c0_i32 = arith.constant 0 : i32
    %c0_i32_0 = arith.constant 0 : i32
    %c0_i32_1 = arith.constant 0 : i32
    return %c0_i32, %c0_i32_0 : i32, i32
  }
  func.func @transform_6(%arg0: i32) -> (i32, i32) {
    %c0_i32 = arith.constant 0 : i32
    %c0_i32_0 = arith.constant 0 : i32
    %c0_i32_1 = arith.constant 0 : i32
    return %c0_i32, %c0_i32_0 : i32, i32
  }
  func.func @transform_7(%arg0: i32) -> (i32, i32) {
    %c0_i32 = arith.constant 0 : i32
    %c0_i32_0 = arith.constant 0 : i32
    return %arg0, %c0_i32 : i32, i32
  }
}

</mosaic_0001>

<bundles_post_ra>
// kernel: encoder_layer_forward.6
= control target key start
LH: loop header
LB: loop body
LE: loop exit
PB: predicated region body
PF: predicated region fallthrough
CT: control target
= control target key end

     0   :  { %v181_v0 = vmov 0.0   ;;  %vm182_vm0 = vmmov 0   ;;  %vm54_vm1 = vcmask 261120   ;;  %s255_s1 = inlined_call_operand.vmem [shape: bf16[32,32], index: 1, kind: input, shape index: {}]   ;;  %s256_s0 = inlined_call_operand.vmem [shape: bf16[16,32], index: 0, kind: input, shape index: {}]   ;;  %s257_s2 = inlined_call_operand.vmem [shape: f32[1,32], index: 2, kind: input, shape index: {}]   ;;  %s258_s3 = inlined_call_operand.vmem [shape: f32[16,32], index: 3, kind: input, shape index: {}]   ;;  %s259_s4 = inlined_call_operand.vmem [shape: f32[1,32], index: 4, kind: input, shape index: {}]   ;;  %s260_s5 = inlined_call_operand.vmem [shape: f32[1,32], index: 5, kind: input, shape index: {}]   ;;  %s261_s6 = inlined_call_operand.vmem [shape: f32[16,32], index: 6, kind: output, shape index: {}]  }
   0x1   :  { %164 = vmatprep.subr.bf16.mxu0 %v181_v0  ;;  %v174_v1 = vld [vmem:[%s255_s1 + $0x8] sm:$0xff]   ;;  %168 = vmatprep.mubr.msk.bf16.mxu0 %vm182_vm0, %v181_v0  ;;  %v175_v2 = vld [vmem:[%s255_s1] sm:$0xff]  }
   0x2   :  { %165 = vmatpush3.bf16.msra.mxu0 %v174_v1  ;;  %v176_v3 = vld [vmem:[%s256_s0] sm:$0xff]   ;;  %v100_v11 = vld [vmem:[%s258_s3 + $0x8] sm:$0xff] }
   0x3   :  { %166 = vmatprep.subr.bf16.mxu0 %v181_v0  ;;  %v154_v4 = vld [vmem:[%s257_s2] ss:$0 sm:$0xff] }
   0x4   :  { %v99_v6 = vld [vmem:[%s258_s3] sm:$0xff] }
   0x5   :  { %v159_v34 = vld [vmem:[%s259_s4] ss:$0 sm:$0xff] }
   0x6   :  { %167 = vmatpush3.bf16.msra.mxu0 %v175_v2  ;;  %v160_v36 = vld [vmem:[%s260_s5] ss:$0 sm:$0xff] }
   0x9   :  { %169 = vmatmul.mubr.msk.bf16.vlgmr.msra.gmra.mxu0 %vm54_vm1, %v176_v3 }
  0xc9   :  { %v92_v5 = vpop.f32.mrf.mxu0 }
  0xca   :  { %v93_v7 = vadd.f32 %v154_v4, %v92_v5 }
  0xcb   :  { %v170_v8 = vpop.f32.mrf.mxu0 }
  0xcc   :  { %v101_v9 = vadd.f32 %v99_v6, %v93_v7 }
  0xcd   :  { %v95_v10 = vpop.f32.mrf.mxu0 }
  0xce   :  { %v96_v12 = vadd.f32 %v154_v4, %v95_v10  ;;  %v103_v13 = vsel %vm54_vm1, %v101_v9, 0.0 }
  0xcf   :  { %104 = vadd.xlane.f32.xlu0 %v103_v13  ;;  %v171_v14 = vpop.f32.mrf.mxu0 }
  0xd0   :  { %v102_v15 = vadd.f32 %v100_v11, %v96_v12 }
  0xd2   :  { %v106_v16 = vsel %vm54_vm1, %v102_v15, 0.0 }
  0xd3   :  { %107 = vadd.xlane.f32.xlu0 %v106_v16 }
 0x158   :  { %v105_v17 = vpop.xlane.xlu0 %104 }
 0x159   :  { %v110_v18 = vmul.f32 0.03125, %v105_v17 }
 0x15b   :  { %v112_v19 = vsub.f32 %v101_v9, %v110_v18 }
 0x15c   :  { %v108_v20 = vpop.xlane.xlu0 %107 }
 0x15d   :  { %v111_v21 = vmul.f32 0.03125, %v108_v20  ;;  %v114_v22 = vmul.f32 %v112_v19, %v112_v19 }
 0x15f   :  { %v113_v23 = vsub.f32 %v102_v15, %v111_v21  ;;  %v116_v24 = vsel %vm54_vm1, %v114_v22, 0.0 }
 0x160   :  { %117 = vadd.xlane.f32.xlu1 %v116_v24 }
 0x161   :  { %v115_v25 = vmul.f32 %v113_v23, %v113_v23 }
 0x163   :  { %v119_v26 = vsel %vm54_vm1, %v115_v25, 0.0 }
 0x164   :  { %120 = vadd.xlane.f32.xlu1 %v119_v26 }
 0x1e9   :  { %v118_v27 = vpop.xlane.xlu1 %117 }
 0x1ea   :  { %v122_v28 = vmul.f32 0.03125, %v118_v27 }
 0x1ec   :  { %v124_v29 = vadd.f32 1e-06, %v122_v28 }
 0x1ed   :  { %v121_v30 = vpop.xlane.xlu1 %120 }
 0x1ee   :  { %177 = vrsqrt.f32 %v124_v29  ;;  %v123_v31 = vmul.f32 0.03125, %v121_v30 }
 0x1f0   :  { %v125_v32 = vadd.f32 1e-06, %v123_v31 }
 0x1f2   :  { %179 = vrsqrt.f32 %v125_v32 }
 0x1fb   :  { %v178_v33 = vpop.eup %177 }
 0x1fc   :  { %v128_v35 = vmul.f32 %v178_v33, %v112_v19 }
 0x1fe   :  { %v137_v37 = vmul.f32 %v159_v34, %v128_v35 }
 0x1ff   :  { %v180_v38 = vpop.eup %179 }
 0x200   :  { %v146_v39 = vadd.f32 %v160_v36, %v137_v37  ;;  %v129_v40 = vmul.f32 %v180_v38, %v113_v23 }
 0x202   :  { %148 = vst.msk [vmem:[%s261_s6] sm:$0xff] %vm54_vm1, %v146_v39  ;;  %v138_v41 = vmul.f32 %v159_v34, %v129_v40 }
 0x204   :  { %v147_v42 = vadd.f32 %v160_v36, %v138_v41 }
 0x206   :  { %149 = vst.msk [vmem:[%s261_s6 + $0x8] sm:$0xff] %vm54_vm1, %v147_v42 }

// kernel: encoder_layer_forward.4
= control target key start
LH: loop header
LB: loop body
LE: loop exit
PB: predicated region body
PF: predicated region fallthrough
CT: control target
= control target key end

     0   :  { %11 = vsyncpa [#allocation3], 0  ;;  %s204_s18 = smov [#allocation2]   ;;  %s280_s0 = inlined_call_operand.vmem [shape: f32[16,32], index: 0, kind: input, shape index: {}]   ;;  %s281_s1 = inlined_call_operand.hbm [shape: bf16[32,96], index: 1, kind: input, shape index: {}]   ;;  %s282_s2 = inlined_call_operand.vmem [shape: f32[1,96], index: 2, kind: input, shape index: {}]   ;;  %s283_s3 = inlined_call_operand.vmem [shape: bf16[16,32], index: 3, kind: output, shape index: {0}]   ;;  %s284_s4 = inlined_call_operand.vmem [shape: bf16[16,32], index: 4, kind: output, shape index: {1}]   ;;  %s285_s5 = inlined_call_operand.vmem [shape: bf16[16,32], index: 5, kind: output, shape index: {2}]  }
   0x1   :  { %s19_s19 = sshll.u32 %s204_s18, 4  ;;  %s20_s19 = int_to_ptr.vmem [resolvable:$true] %s19_s19 }
   0x2   :  { %s190_s20 = scalar_lea.vmem %s20_s19, 256  ;;  %p195_p1 = scmp.lt.s32.totalorder %s20_s19, %s20_s19 }
   0x3   :  { %p191_p0 = scmp.ne.s32.totalorder %s20_s19, %s190_s20  ;;  %p196_p2 = scmp.lt.s32.totalorder %s190_s20, %s190_s20 }
   0x5   :  { %p197_p3 = por %p196_p2, %p195_p1 }
   0x7   :  { %p198_p4 = pnand %p197_p3, %p191_p0 }
   0x9   :  { %201 = shalt.err (!%p198_p4)
}
   0xa   :  { %s205_s21 = smov 64   ;;  %s206_s22 = smov 4  }
   0xb   :  { %25 = dma.hbm_to_vmem [thread:$0]  %s281_s1, 256, %s20_s19, [#allocation3], %s205_s21, %s205_s21, %s206_s22  }
   0xc   :  { %202 = dma.done.wait [#allocation3], 256  }
   0xd   :  { %203 = vsyncadd [#allocation3], 4294967040  ;;  %v207_v0 = vmov 0.0   ;;  %vm208_vm0 = vmmov 0   ;;  %v180_v1 = vld [vmem:[#allocation2 + $0x8] sm:$0xff]   ;;  %v181_v2 = vld [vmem:[#allocation2] sm:$0xff]  }
   0xe   :  { %166 = vmatprep.subr.bf16.mxu0 %v207_v0  ;;  %170 = vmatprep.mubr.msk.bf16.mxu0 %vm208_vm0, %v207_v0  ;;  %v32_v3 = vld [vmem:[%s280_s0] sm:$0xff]  ;;  %v33_v4 = vld [vmem:[%s280_s0 + $0x8] sm:$0xff]  ;;  %vm58_vm1 = vcmask 261120   ;;  %vm113_vm2 = vcmask 257024   ;;  %s209_s0 = smov 96  }
   0xf   :  { %167 = vmatpush3.bf16.msra.mxu0 %v180_v1  ;;  %v34_v5 = vpack.c.bf16 %v33_v4, %v32_v3  ;;  %v151_v6 = vld [vmem:[%s282_s2] ss:$0 sm:$0xff] }
  0x10   :  { %168 = vmatprep.subr.bf16.mxu0 %v207_v0 }
  0x13   :  { %169 = vmatpush3.bf16.msra.mxu0 %v181_v2 }
  0x16   :  { %171 = vmatmul.mubr.msk.bf16.vlgmr.msra.gmra.mxu0 %vm58_vm1, %v34_v5 }
  0xd6   :  { %v96_v7 = vpop.f32.mrf.mxu0 }
  0xd7   :  { %v97_v8 = vadd.f32 %v151_v6, %v96_v7 }
  0xd8   :  { %v172_v9 = vpop.f32.mrf.mxu0 }
  0xd9   :  { %v103_v10 = vmul.f32 0.35355338, %v97_v8  ;;  %v161_v11 = vpack.c.bf16 %v97_v8, %v97_v8 }
  0xda   :  { %v99_v12 = vpop.f32.mrf.mxu0 }
  0xdb   :  { %v159_v13 = vpack.c.bf16 %v103_v10, %v103_v10  ;;  %v100_v14 = vadd.f32 %v151_v6, %v99_v12  ;;  %130 = vrot.lane.b32.xlu1 %v161_v11, %s205_s21  ;;  %122 = vrot.lane.b32.xlu0 %v161_v11, %s209_s0 }
  0xdc   :  { %v173_v15 = vpop.f32.mrf.mxu0 }
  0xdd   :  { %114 = vst.msk [vmem:[%s283_s3] sm:$0xf] %vm113_vm2, %v159_v13  ;;  %v104_v16 = vmul.f32 0.35355338, %v100_v14  ;;  %v162_v17 = vpack.c.bf16 %v100_v14, %v100_v14 }
  0xdf   :  { %v160_v18 = vpack.c.bf16 %v104_v16, %v104_v16  ;;  %132 = vrot.lane.b32.xlu1 %v162_v17, %s205_s21  ;;  %124 = vrot.lane.b32.xlu0 %v162_v17, %s209_s0 }
  0xe1   :  { %115 = vst.msk [vmem:[%s283_s3 + $0x4] sm:$0xf] %vm113_vm2, %v160_v18 }
 0x14d   :  { %v131_v19 = vpop.permute.xlu1 %130  ;;  %v123_v20 = vpop.permute.xlu0 %122 }
 0x14e   :  { %136 = vst.msk [vmem:[%s285_s5] sm:$0xf] %vm113_vm2, %v131_v19  ;;  %128 = vst.msk [vmem:[%s284_s4] sm:$0xf] %vm113_vm2, %v123_v20 }
 0x151   :  { %v133_v21 = vpop.permute.xlu1 %132  ;;  %v125_v22 = vpop.permute.xlu0 %124 }
 0x152   :  { %137 = vst.msk [vmem:[%s285_s5 + $0x4] sm:$0xf] %vm113_vm2, %v133_v21  ;;  %129 = vst.msk [vmem:[%s284_s4 + $0x4] sm:$0xf] %vm113_vm2, %v125_v22 }
 0x153   :  { %150 = vsyncpa [#allocation3], 1 }

// kernel: encoder_layer_forward.5
= control target key start
LH: loop header
LB: loop body
LE: loop exit
PB: predicated region body
PF: predicated region fallthrough
CT: control target
= control target key end

     0   :  { %11 = vsyncpa [#allocation3], 0  ;;  %s2917_s0 = inlined_call_operand.vmem [shape: bf16[2,8,32], index: 0, kind: input, shape index: {}]   ;;  %s2918_s1 = inlined_call_operand.vmem [shape: bf16[2,8,32], index: 1, kind: input, shape index: {}]   ;;  %s2919_s2 = inlined_call_operand.vmem [shape: bf16[2,8,32], index: 2, kind: input, shape index: {}]   ;;  %s2920_s3 = inlined_call_operand.vmem [shape: s8[2,8,8], index: 3, kind: input, shape index: {}]   ;;  %s2921_s4 = inlined_call_operand.vmem [shape: bf16[2,8,32], index: 4, kind: output, shape index: {0}]   ;;  %s2922_s5 = inlined_call_operand.hbm [shape: f32[2,4,8,8], index: 5, kind: output, shape index: {1}]  }
   0x1   :  { %13 = vsyncpa [#allocation3 + $0x1], 0  ;;  %s2571_s18 = smov 0   ;;  %s2573_s19 = smov 0  }
   0x2   :  { %s2575_s20 = smov 0   ;;  %s2577_s21 = smov 0  }
   0x3 LB: > { %s2592_s22 = sadd.s32 4294967295, %s2526_s21   ;;  %s2307_s23 = sadd.s32 4294967294, %s2526_s21   ;;  %s2526_s21 = sphi %s2577_s21, %s2930_s21   ;;  %s2522_s20 = sphi %s2575_s20, %s2929_s20   ;;  %s2518_s19 = sphi %s2573_s19, %s2928_s19   ;;  %s2514_s18 = sphi %s2571_s18, %s2927_s18  }
   0x4   : > { %s2596_s24 = sadd.s32 1, %s2526_s21   ;;  %s156_s25 = sadd.s32 1, %s2522_s20 }
   0x5   : > { %s153_s26 = ssub.s32 %s2526_s21, %s2596_s24  ;;  %p166_p0 = scmp.ne.s32.totalorder %s2522_s20, %s2518_s19 }
   0x6   : > { %p154_p1 = scmp.eq.s32.totalorder %s153_s26, 0  ;;  %p167_p2 = scmp.eq.s32.totalorder %s2592_s22, 1 }
   0x7   : > { %p172_p3 = scmp.ne.s32.totalorder %s2518_s19, %s2514_s18  ;;  %p173_p4 = scmp.eq.s32.totalorder %s2307_s23, 1 }
   0x8   : > { %s2607_s27 = scalar_select %p154_p1, %s2522_s20, %s156_s25  }
   0x9   : > { %p2609_p5 = por %p167_p2, %p166_p0  ;;  %p2613_p6 = por %p173_p4, %p172_p3 }
   0xa   : > { %p2310_p7 = scmp.ge.s32.totalorder %s2526_s21, 1  ;;  %p219_p8 = scmp.lt.s32.totalorder %s2526_s21, 3 }
   0xc   : > { %p220_p9 = pnand %p2310_p7, %p219_p8 }
   0xd   : > { %p262_p10 = scmp.lt.s32.totalorder (!%p220_p9), %s2592_s22, 1  ;;  %s2528_s10 = smov (!%p220_p9), 120  }
   0xe   : > { %223 = sbr.rel (%p220_p9) target bundleno = 1537 (0x601), region = 36  ;;  %s2529_s11 = smov (!%p220_p9), 104  }
   0xf   : > { %s2530_s12 = smov (!%p220_p9), 112   ;;  %s2536_s17 = smov (!%p220_p9), [#allocation2]  }
  0x13   : > { %s2621_s30 = scalar_select %p262_p10, %s2592_s22, 1  ;;  %v2531_v1 = vmov 1983009808   ;;  %v309_v3 = vlaneseq  ;;  %v2532_v6 = vmov 1934713408   ;;  %v2533_v34 = vmov 0  }
  0x14   : > { %v307_v2 = vunpack.c.l.s4 %v2531_v1  ;;  %v324_v7 = vunpack.c.l.s4 %v2532_v6  ;;  %v2534_v60 = vmov 0.0   ;;  %vm2535_vm0 = vmmov 0  }
  0x15   : > { %s2624_s6 = sshll.u32 %s2621_s30, 2  ;;  %v310_v5 = vshrl.u32 %v309_v3, 7  ;;  %2351 = vmatprep.subr.bf16.mxu0 %v2534_v60  ;;  %2357 = vmatprep.subr.bf16.mxu1 %v2534_v60  ;;  %vm1033_vm1 = vcmask 1043456   ;;  %vm1029_vm2 = vcmask 64512   ;;  %s2315_s25 = sshll.u32 %s2621_s30, 1 }
  0x16   : > { %s269_s9 = scalar_lea.vmem %s2918_s1, %s2624_s6  ;;  %v308_v4 = vunpack.c.0.s8 %v307_v2  ;;  %v325_v15 = vunpack.c.0.s8 %v324_v7  ;;  %s265_s15 = scalar_lea.vmem %s2917_s0, %s2624_s6  ;;  %2353 = vmatprep.mubr.msk.bf16.mxu0 %vm2535_vm0, %v2534_v60  ;;  %2359 = vmatprep.mubr.msk.bf16.mxu1 %vm2535_vm0, %v2534_v60 }
  0x17   : > { %v373_v0 = vld [vmem:[%s269_s9] sm:$0xf]  ;;  %s273_s23 = scalar_lea.vmem %s2919_s2, %s2624_s6  ;;  %s277_s8 = scalar_lea.vmem %s2920_s3, %s2315_s25 }
  0x18   : > { %375 = vrot.lane.b32.xlu0 %v373_v0, %s2528_s10  ;;  %379 = vrot.lane.b32.xlu1 %v373_v0, %s2529_s11  ;;  %v384_v10 = vshrl.u32 %v373_v0, 16  ;;  %v2633_v12 = vsub.s32 %v308_v4, %v310_v5  ;;  %v2637_v23 = vsub.s32 %v325_v15, %v310_v5  ;;  %v2653_v39 = vld [vmem:[%s265_s15] sm:$0xf]  ;;  %s259_s30 = sand.u32 1, %s2518_s19  }
  0x19   : > { %s2311_s9 = sshll.u32 %s259_s30, 5 }
  0x1c   : > { %377 = vrot.lane.b32.xlu0 %v373_v0, %s2530_s12 }
  0x8a   : > { %v376_v8 = vpop.permute.xlu0 %375  ;;  %v380_v9 = vpop.permute.xlu1 %379 }
  0x8b   : > { %v385_v11 = vshrl.u32 %v376_v8, 16  ;;  %v383_v13 = vpack.i.b16 %v376_v8, %v373_v0  ;;  %v391_v14 = vshrl.u32 %v380_v9, 16 }
  0x8d   : > { %v386_v17 = vpack.i.b16 %v385_v11, %v384_v10  ;;  %v400_v20 = vrot.slane %v383_v13, %v2633_v12 }
  0x8e   : > { %v378_v16 = vpop.permute.xlu0 %377 }
  0x8f   : > { %v389_v18 = vpack.i.b16 %v380_v9, %v378_v16  ;;  %v390_v19 = vshrl.u32 %v378_v16, 16  ;;  %v434_v26 = vrot.slane %v386_v17, %v2633_v12 }
  0x91   : > { %v392_v21 = vpack.i.b16 %v391_v14, %v390_v19  ;;  %v408_v22 = vrot.slane %v389_v18, %v2633_v12 }
  0x93   : > { %v410_v24 = vcombine.high %v400_v20, %v408_v22  ;;  %v409_v25 = vcombine.low %v400_v20, %v408_v22  ;;  %v442_v27 = vrot.slane %v392_v21, %v2633_v12  ;;  %v2683_v21 = vld [vmem:[%s273_s23] sm:$0xf]  ;;  %s2470_s23 = sshll.u32 %s2536_s17, 4  ;;  %s2471_s23 = int_to_ptr.vmem [resolvable:$false] %s2470_s23 }
  0x94   : > { %s2472_s25 = scalar_lea.vmem %s2471_s23, 1024 }
  0x95   : > { %v424_v28 = vrot.slane %v410_v24, %v2637_v23  ;;  %v417_v29 = vrot.slane %v409_v25, %v2637_v23  ;;  %v444_v30 = vcombine.high %v434_v26, %v442_v27  ;;  %v443_v31 = vcombine.low %v434_v26, %v442_v27 }
  0x97   : > { %675 = vxpose.xlu0.c.b16.start.end [1/1] (short) (narrow) %v424_v28, 16  ;;  %611 = vxpose.xlu1.c.b16.start.end [1/1] (short) (narrow) %v417_v29, 16  ;;  %v458_v32 = vrot.slane %v444_v30, %v2637_v23  ;;  %v451_v33 = vrot.slane %v443_v31, %v2637_v23  ;;  %v425_v35 = vcombine.high %v417_v29, %v2533_v34  ;;  %v296_v29 = vshrl.u32 %v2653_v39, 16 }
  0x98   : > { %v426_v37 = vcombine.high %v424_v28, %v2533_v34 }
  0x99   : > { %v459_v36 = vcombine.high %v451_v33, %v2533_v34  ;;  %v460_v38 = vcombine.high %v458_v32, %v2533_v34 }
  0x9b   : > { %691 = vxpose.xlu1.c.b16.start.end [1/1] (short) (narrow) %v458_v32, 16  ;;  %627 = vxpose.xlu0.c.b16.start.end [1/1] (short) (narrow) %v451_v33, 16 }
  0x9f   : > { %643 = vxpose.xlu0.c.b16.start.end [1/1] (short) (narrow) %v425_v35, 16  ;;  %659 = vxpose.xlu1.c.b16.start.end [1/1] (short) (narrow) %v459_v36, 16 }
  0xa3   : > { %707 = vxpose.xlu0.c.b16.start.end [1/1] (short) (narrow) %v426_v37, 16  ;;  %723 = vxpose.xlu1.c.b16.start.end [1/1] (short) (narrow) %v460_v38, 16 }
  0xa7   : > { %289 = vrot.lane.b32.xlu1 %v2653_v39, %s2530_s12 }
  0xab   : > { %291 = vrot.lane.b32.xlu1 %v2653_v39, %s2529_s11 }
  0xac   : > { %287 = vrot.lane.b32.xlu0 %v2653_v39, %s2528_s10 }
  0xf9   : > { %v683_v40 = vpop.trf.xlu0  ;;  %v619_v41 = vpop.trf.xlu1 }
  0xfa   : > { %v739_v46 = vcombine.low %v619_v41, %v683_v40 }
  0xfc   : > { %v746_v52 = vrot.slane %v739_v46, %v2633_v12 }
  0xfd   : > { %v699_v42 = vpop.trf.xlu1  ;;  %v635_v43 = vpop.trf.xlu0 }
  0xfe   : > { %v773_v47 = vcombine.low %v635_v43, %v699_v42 }
 0x100   : > { %v780_v53 = vrot.slane %v773_v47, %v2633_v12 }
 0x101   : > { %v651_v44 = vpop.trf.xlu0  ;;  %v667_v45 = vpop.trf.xlu1 }
 0x105   : > { %v715_v48 = vpop.trf.xlu0  ;;  %v731_v49 = vpop.trf.xlu1 }
 0x106   : > { %v747_v50 = vcombine.low %v651_v44, %v715_v48  ;;  %v781_v51 = vcombine.low %v667_v45, %v731_v49 }
 0x108   : > { %v754_v54 = vrot.slane %v747_v50, %v2633_v12  ;;  %v788_v55 = vrot.slane %v781_v51, %v2633_v12 }
 0x10a   : > { %v755_v56 = vcombine.low %v746_v52, %v754_v54  ;;  %v756_v57 = vcombine.high %v746_v52, %v754_v54  ;;  %v789_v58 = vcombine.low %v780_v53, %v788_v55  ;;  %v790_v59 = vcombine.high %v780_v53, %v788_v55 }
 0x10c   : > { %v763_v61 = vrot.slane %v755_v56, %v2637_v23  ;;  %v770_v62 = vrot.slane %v756_v57, %v2637_v23  ;;  %v797_v63 = vrot.slane %v789_v58, %v2637_v23  ;;  %v804_v0 = vrot.slane %v790_v59, %v2637_v23 }
 0x10e   : > { %v825_v1 = vpack.i.b16 %v804_v0, %v770_v62  ;;  %v809_v2 = vpack.i.b16 %v797_v63, %v763_v61  ;;  %v811_v3 = vshrl.u32 %v763_v61, 16  ;;  %v812_v4 = vshrl.u32 %v797_v63, 16 }
 0x10f   : > { %v771_v5 = vcombine.high %v763_v61, %v2533_v34  ;;  %v805_v6 = vcombine.high %v797_v63, %v2533_v34  ;;  %v772_v7 = vcombine.high %v770_v62, %v2533_v34  ;;  %v806_v8 = vcombine.high %v804_v0, %v2533_v34 }
 0x110   : > { %903 = vxpose.xlu1.c.b16.start.end [1/1] (short) (narrow) %v825_v1, 16  ;;  %839 = vxpose.xlu0.c.b16.start.end [1/1] (short) (narrow) %v809_v2, 16  ;;  %v813_v9 = vpack.i.b16 %v812_v4, %v811_v3  ;;  %v827_v11 = vshrl.u32 %v770_v62, 16  ;;  %v828_v13 = vshrl.u32 %v804_v0, 16 }
 0x111   : > { %v817_v10 = vpack.i.b16 %v805_v6, %v771_v5  ;;  %v833_v14 = vpack.i.b16 %v806_v8, %v772_v7  ;;  %v819_v16 = vshrl.u32 %v771_v5, 16  ;;  %v820_v17 = vshrl.u32 %v805_v6, 16 }
 0x112   : > { %v829_v15 = vpack.i.b16 %v828_v13, %v827_v11  ;;  %v835_v19 = vshrl.u32 %v772_v7, 16  ;;  %v836_v20 = vshrl.u32 %v806_v8, 16 }
 0x113   : > { %v821_v18 = vpack.i.b16 %v820_v17, %v819_v16 }
 0x114   : > { %855 = vxpose.xlu1.c.b16.start.end [1/1] (short) (narrow) %v813_v9, 16  ;;  %871 = vxpose.xlu0.c.b16.start.end [1/1] (short) (narrow) %v817_v10, 16  ;;  %v837_v22 = vpack.i.b16 %v836_v20, %v835_v19 }
 0x118   : > { %935 = vxpose.xlu1.c.b16.start.end [1/1] (short) (narrow) %v833_v14, 16  ;;  %919 = vxpose.xlu0.c.b16.start.end [1/1] (short) (narrow) %v829_v15, 16 }
 0x119   : > { %v290_v24 = vpop.permute.xlu1 %289 }
 0x11a   : > { %v302_v27 = vshrl.u32 %v290_v24, 16 }
 0x11c   : > { %887 = vxpose.xlu0.c.b16.start.end [1/1] (short) (narrow) %v821_v18, 16  ;;  %463 = vrot.lane.b32.xlu1 %v2683_v21, %s2528_s10  ;;  %s2817_s10 = scalar_lea.vmem [#allocation2], %s2311_s9 }
 0x11d   : > { %v292_v25 = vpop.permute.xlu1 %291  ;;  %s2185_s15 = sshll.u32 %s2817_s10, 4  ;;  %s2868_s15 = int_to_ptr.vmem [resolvable:$true] %s2185_s15 }
 0x11e   : > { %v288_v26 = vpop.permute.xlu0 %287  ;;  %v303_v28 = vshrl.u32 %v292_v25, 16  ;;  %v301_v31 = vpack.i.b16 %v292_v25, %v290_v24  ;;  %s2466_s16 = scalar_lea.vmem %s2868_s15, 512  ;;  %p2473_p0 = scmp.lt.s32.totalorder %s2868_s15, %s2471_s23 }
 0x11f   : > { %v297_v30 = vshrl.u32 %v288_v26, 16  ;;  %v295_v32 = vpack.i.b16 %v288_v26, %v2653_v39  ;;  %p2467_p11 = scmp.ne.s32.totalorder %s2868_s15, %s2466_s16  ;;  %p2474_p1 = scmp.lt.s32.totalorder %s2472_s25, %s2466_s16 }
 0x120   : > { %951 = vxpose.xlu0.c.b16.start.end [1/1] (short) (narrow) %v837_v22, 16  ;;  %v304_v33 = vpack.i.b16 %v303_v28, %v302_v27  ;;  %v320_v36 = vrot.slane %v301_v31, %v2633_v12 }
 0x121   : > { %v298_v35 = vpack.i.b16 %v297_v30, %v296_v29  ;;  %v312_v37 = vrot.slane %v295_v32, %v2633_v12  ;;  %p2468_p12 = pnand %p2467_p11, %p2609_p5  ;;  %p2475_p2 = por %p2474_p1, %p2473_p0 }
 0x122   : > { %v354_v38 = vrot.slane %v304_v33, %v2633_v12 }
 0x123   : > { %v346_v40 = vrot.slane %v298_v35, %v2633_v12  ;;  %v321_v43 = vcombine.low %v312_v37, %v320_v36  ;;  %v322_v44 = vcombine.high %v312_v37, %v320_v36  ;;  %p2469_p13 = pneg %p2468_p12 }
 0x125   : > { %v355_v45 = vcombine.low %v346_v40, %v354_v38  ;;  %v356_v46 = vcombine.high %v346_v40, %v354_v38  ;;  %v329_v39 = vrot.slane %v321_v43, %v2637_v23  ;;  %v336_v49 = vrot.slane %v322_v44, %v2637_v23  ;;  %p2476_p3 = pnand %p2475_p2, %p2469_p13 }
 0x127   : > { %v363_v50 = vrot.slane %v355_v45, %v2637_v23  ;;  %v370_v51 = vrot.slane %v356_v46, %v2637_v23  ;;  %v549_v55 = vcombine.low %v329_v39, %v336_v49  ;;  %v2317_v57 = vcombine.high %v329_v39, %v336_v49  ;;  %v1215_v46 = vld [vmem:[%s277_s8] sm:$0x3] }
 0x128   : > { %vm1216_vm3 = vnez %v1215_v46 }
 0x129   : > { %v574_v58 = vcombine.low %v363_v50, %v370_v51  ;;  %v2318_v59 = vcombine.high %v363_v50, %v370_v51  ;;  %v556_v0 = vrot.slane %v549_v55, %v2633_v12  ;;  %v564_v1 = vrot.slane %v2317_v57, %v2633_v12 }
 0x12b   : > { %v581_v2 = vrot.slane %v574_v58, %v2633_v12  ;;  %v589_v3 = vrot.slane %v2318_v59, %v2633_v12  ;;  %v565_v8 = vcombine.low %v556_v0, %v564_v1 }
 0x12d   : > { %v590_v10 = vcombine.low %v581_v2, %v589_v3  ;;  %v572_v15 = vrot.slane %v565_v8, %v2637_v23 }
 0x12f   : > { %v597_v16 = vrot.slane %v590_v10, %v2637_v23  ;;  %v602_v25 = vshrl.u32 %v572_v15, 16  ;;  %v573_v38 = vcombine.high %v572_v15, %v2533_v34 }
 0x131   : > { %v603_v26 = vshrl.u32 %v597_v16, 16  ;;  %v601_v33 = vpack.i.b16 %v597_v16, %v572_v15  ;;  %v598_v40 = vcombine.high %v597_v16, %v2533_v34 }
 0x133   : > { %v604_v37 = vpack.i.b16 %v603_v26, %v602_v25  ;;  %v609_v43 = vshrl.u32 %v598_v40, 16  ;;  %v607_v44 = vpack.i.b16 %v598_v40, %v573_v38 }
 0x172   : > { %v911_v41 = vpop.trf.xlu1  ;;  %v847_v42 = vpop.trf.xlu0 }
 0x173   : > { %v967_v52 = vcombine.low %v847_v42, %v911_v41  ;;  %v608_v42 = vshrl.u32 %v573_v38, 16 }
 0x175   : > { %v974_v62 = vrot.slane %v967_v52, %v2633_v12  ;;  %v610_v45 = vpack.i.b16 %v609_v43, %v608_v42 }
 0x176   : > { %v863_v47 = vpop.trf.xlu1  ;;  %v879_v48 = vpop.trf.xlu0 }
 0x17a   : > { %v943_v53 = vpop.trf.xlu1  ;;  %v927_v54 = vpop.trf.xlu0 }
 0x17b   : > { %v975_v56 = vcombine.low %v879_v48, %v943_v53  ;;  %v992_v5 = vcombine.low %v863_v47, %v927_v54  ;;  %v1217_v47 = vsel %vm1216_vm3, 16843009, %v2533_v34 }
 0x17c   : > { %v1218_v48 = vunpack.c.0.s8 %v1217_v47 }
 0x17d   : > { %v982_v61 = vrot.slane %v975_v56, %v2633_v12  ;;  %v999_v11 = vrot.slane %v992_v5, %v2633_v12 }
 0x17e   : > { %v895_v63 = vpop.trf.xlu0  ;;  %vm2738_vm4 = vcmp.ne.s32.totalorder %v1218_v48, 0 }
 0x17f   : > { %v983_v4 = vcombine.low %v974_v62, %v982_v61 }
 0x181   : > { %v990_v9 = vrot.slane %v983_v4, %v2637_v23 }
 0x182   : > { %v959_v6 = vpop.trf.xlu0 }
 0x183   : > { %v1000_v7 = vcombine.low %v895_v63, %v959_v6  ;;  %v991_v17 = vcombine.high %v990_v9, %v2533_v34  ;;  %v1020_v20 = vshrl.u32 %v990_v9, 16 }
 0x185   : > { %v1007_v13 = vrot.slane %v1000_v7, %v2633_v12  ;;  %v1026_v27 = vshrl.u32 %v991_v17, 16 }
 0x187   : > { %v1008_v14 = vcombine.low %v999_v11, %v1007_v13 }
 0x189   : > { %v1015_v18 = vrot.slane %v1008_v14, %v2637_v23  ;;  %v472_v14 = vshrl.u32 %v2683_v21, 16 }
 0x18b   : > { %v1019_v19 = vpack.i.b16 %v1015_v18, %v990_v9  ;;  %v1021_v22 = vshrl.u32 %v1015_v18, 16  ;;  %v1016_v24 = vcombine.high %v1015_v18, %v2533_v34 }
 0x18d   : > { %v1035_v28 = vsel %vm1033_vm1, %v1019_v19, 0  ;;  %v1022_v29 = vpack.i.b16 %v1021_v22, %v1020_v20  ;;  %v1025_v30 = vpack.i.b16 %v1016_v24, %v991_v17  ;;  %v1027_v31 = vshrl.u32 %v1016_v24, 16 }
 0x18e   : > { %2352 = vmatpush3.bf16.msra.mxu0 %v1035_v28  ;;  %v464_v10 = vpop.permute.xlu1 %463 }
 0x18f   : > { %v1081_v32 = vsel %vm1033_vm1, %v1022_v29, 0  ;;  %2363 = vmatprep.subr.bf16.mxu0 %v2534_v60  ;;  %v1028_v35 = vpack.i.b16 %v1027_v31, %v1026_v27  ;;  %v1127_v36 = vsel %vm1033_vm1, %v1025_v30, 0  ;;  %v473_v15 = vshrl.u32 %v464_v10, 16 }
 0x190   : > { %2358 = vmatpush3.bf16.msra.mxu1 %v1081_v32  ;;  %v471_v17 = vpack.i.b16 %v464_v10, %v2683_v21 }
 0x191   : > { %2354 = vmatmul.mubr.msk.bf16.vlgmr.msra.gmra.mxu0 %vm1029_vm2, %v601_v33  ;;  %2369 = vmatprep.subr.bf16.mxu1 %v2534_v60  ;;  %v1173_v41 = vsel %vm1033_vm1, %v1028_v35, 0  ;;  %v474_v20 = vpack.i.b16 %v473_v15, %v472_v14 }
 0x192   : > { %2364 = vmatpush3.bf16.msra.mxu0 %v1127_v36  ;;  %2365 = vmatprep.mubr.msk.bf16.mxu0 %vm2535_vm0, %v2534_v60  ;;  %v488_v25 = vrot.slane %v471_v17, %v2633_v12 }
 0x193   : > { %2360 = vmatmul.mubr.msk.bf16.vlgmr.msra.gmra.mxu1 %vm1029_vm2, %v604_v37  ;;  %2375 = vmatprep.subr.bf16.mxu0 %v2534_v60  ;;  %v522_v28 = vrot.slane %v474_v20, %v2633_v12 }
 0x194   : > { %2370 = vmatpush3.bf16.msra.mxu1 %v1173_v41  ;;  %2371 = vmatprep.mubr.msk.bf16.mxu1 %vm2535_vm0, %v2534_v60 }
 0x195   : > { %2381 = vmatprep.subr.bf16.mxu1 %v2534_v60 }
 0x199   : > { %2366 = vmatmul.mubr.msk.bf16.vlgmr.msra.gmra.mxu0 %vm1029_vm2, %v607_v44 }
 0x19a   : > { %2377 = vmatprep.mubr.msk.bf16.mxu0 %vm2535_vm0, %v2534_v60 }
 0x19b   : > { %2372 = vmatmul.mubr.msk.bf16.vlgmr.msra.gmra.mxu1 %vm1029_vm2, %v610_v45 }
 0x19c   : > { %2383 = vmatprep.mubr.msk.bf16.mxu1 %vm2535_vm0, %v2534_v60 }
 0x251   : > { %v1071_v49 = vpop.f32.mrf.mxu0 }
 0x252   : > { %v2744_v50 = vsel %vm2738_vm4, -1e+09, %v1071_v49 }
 0x253   : > { %v2355_v51 = vpop.f32.mrf.mxu0  ;;  %v1117_v52 = vpop.f32.mrf.mxu1  ;;  %v1226_v53 = vsel %vm1029_vm2, %v2744_v50, -inf }
 0x254   : > { %v2750_v54 = vsel %vm2738_vm4, -1e+09, %v1117_v52  ;;  %1227 = vmax.xlane.f32.xlu1 %v1226_v53 }
 0x255   : > { %v1074_v55 = vpop.f32.mrf.mxu0  ;;  %v2361_v56 = vpop.f32.mrf.mxu1  ;;  %v1229_v57 = vsel %vm1029_vm2, %v2750_v54, -inf }
 0x256   : > { %1230 = vmax.xlane.f32.xlu0 %v1229_v57 }
 0x257   : > { %v2356_v58 = vpop.f32.mrf.mxu0  ;;  %v1120_v59 = vpop.f32.mrf.mxu1 }
 0x259   : > { %v2362_v61 = vpop.f32.mrf.mxu1  ;;  %v1163_v62 = vpop.f32.mrf.mxu0 }
 0x25a   : > { %v2760_v6 = vsel %vm2738_vm4, -1e+09, %v1163_v62 }
 0x25b   : > { %v2367_v63 = vpop.f32.mrf.mxu0  ;;  %v1209_v0 = vpop.f32.mrf.mxu1  ;;  %v1232_v8 = vsel %vm1029_vm2, %v2760_v6, -inf }
 0x25c   : > { %v2764_v7 = vsel %vm2738_vm4, -1e+09, %v1209_v0 }
 0x25d   : > { %v1166_v1 = vpop.f32.mrf.mxu0  ;;  %v2373_v2 = vpop.f32.mrf.mxu1  ;;  %v1235_v9 = vsel %vm1029_vm2, %v2764_v7, -inf }
 0x25f   : > { %v2368_v3 = vpop.f32.mrf.mxu0  ;;  %v1212_v4 = vpop.f32.mrf.mxu1 }
 0x261   : > { %v2374_v5 = vpop.f32.mrf.mxu1 }
 0x265   : > { %467 = vrot.lane.b32.xlu1 %v2683_v21, %s2529_s11  ;;  %s2334_s11 = sshll.u32 %s2592_s22, 9  ;;  %s2872_s22 = scalar_lea.sflag [#allocation3], %s259_s30 }
 0x266   : > { %s2861_s14 = scalar_lea.hbm %s2922_s5, %s2334_s11 }
 0x26c   : > { %465 = vrot.lane.b32.xlu0 %v2683_v21, %s2530_s12 }
 0x289   : > { %1233 = vmax.xlane.f32.xlu1 %v1232_v8 }
 0x28b   : > { %1236 = vmax.xlane.f32.xlu0 %v1235_v9 }
 0x2dd   : > { %v2770_v11 = vpop.xlane.xlu1 %1227 }
 0x2de   : > { %v1238_v2 = vsub.f32 %v2744_v50, %v2770_v11 }
 0x2df   : > { %v2772_v13 = vpop.xlane.xlu0 %1230 }
 0x2e0   : > { %v1239_v5 = vsub.f32 %v2750_v54, %v2772_v13  ;;  %v1242_v17 = vmul.f32 1.442695, %v1238_v2 }
 0x2e1   : > { %v468_v16 = vpop.permute.xlu1 %467 }
 0x2e2   : > { %v479_v18 = vshrl.u32 %v468_v16, 16  ;;  %v1244_v20 = vmul.f32 1.442695, %v1239_v5  ;;  %2450 = vpow2.f32 %v1242_v17 }
 0x2e3   : > { %v466_v19 = vpop.permute.xlu0 %465 }
 0x2e4   : > { %v478_v22 = vshrl.u32 %v466_v19, 16  ;;  %v477_v24 = vpack.i.b16 %v468_v16, %v466_v19  ;;  %2452 = vpow2.f32 %v1244_v20 }
 0x2e6   : > { %v480_v26 = vpack.i.b16 %v479_v18, %v478_v22  ;;  %v496_v27 = vrot.slane %v477_v24, %v2633_v12 }
 0x2e8   : > { %v497_v29 = vcombine.low %v488_v25, %v496_v27  ;;  %v530_v30 = vrot.slane %v480_v26, %v2633_v12  ;;  %v498_v37 = vcombine.high %v488_v25, %v496_v27 }
 0x2ea   : > { %v505_v31 = vrot.slane %v497_v29, %v2637_v23  ;;  %v531_v32 = vcombine.low %v522_v28, %v530_v30  ;;  %v532_v35 = vcombine.high %v522_v28, %v530_v30  ;;  %v512_v40 = vrot.slane %v498_v37, %v2637_v23 }
 0x2ec   : > { %1274 = vxpose.xlu1.c.b16.start.end [1/1] (short) (narrow) %v505_v31, 16  ;;  %v539_v21 = vrot.slane %v531_v32, %v2637_v23  ;;  %v513_v36 = vcombine.high %v505_v31, %v2533_v34  ;;  %v546_v38 = vrot.slane %v532_v35, %v2637_v23  ;;  %v514_v42 = vcombine.high %v512_v40, %v2533_v34 }
 0x2ee   : > { %1290 = vxpose.xlu0.c.b16.start.end [1/1] (short) (narrow) %v539_v21, 16  ;;  %v547_v33 = vcombine.high %v539_v21, %v2533_v34  ;;  %v548_v41 = vcombine.high %v546_v38, %v2533_v34 }
 0x2f0   : > { %1322 = vxpose.xlu1.c.b16.start.end [1/1] (short) (narrow) %v547_v33, 16 }
 0x2f2   : > { %1306 = vxpose.xlu0.c.b16.start.end [1/1] (short) (narrow) %v513_v36, 16 }
 0x2f4   : > { %1354 = vxpose.xlu1.c.b16.start.end [1/1] (short) (narrow) %v546_v38, 16 }
 0x2f6   : > { %1338 = vxpose.xlu0.c.b16.start.end [1/1] (short) (narrow) %v512_v40, 16 }
 0x2f8   : > { %1386 = vxpose.xlu1.c.b16.start.end [1/1] (short) (narrow) %v548_v41, 16 }
 0x2fa   : > { %1370 = vxpose.xlu0.c.b16.start.end [1/1] (short) (narrow) %v514_v42, 16 }
 0x312   : > { %v1234_v43 = vpop.xlane.xlu1 %1233 }
 0x313   : > { %v1240_v18 = vsub.f32 %v2760_v6, %v1234_v43 }
 0x314   : > { %v1237_v44 = vpop.xlane.xlu0 %1236 }
 0x315   : > { %v1241_v22 = vsub.f32 %v2764_v7, %v1237_v44  ;;  %v1246_v25 = vmul.f32 1.442695, %v1240_v18  ;;  %v2451_v7 = vpop.eup %2450 }
 0x316   : > { %v2453_v31 = vpop.eup %2452  ;;  %v1250_v32 = vsel %vm1029_vm2, %v2451_v7, 0.0 }
 0x317   : > { %v1248_v6 = vmul.f32 1.442695, %v1241_v22  ;;  %2454 = vpow2.f32 %v1246_v25  ;;  %v1253_v33 = vsel %vm1029_vm2, %v2453_v31, 0.0 }
 0x319   : > { %2456 = vpow2.f32 %v1248_v6 }
 0x324   : > { %v2455_v21 = vpop.eup %2454 }
 0x325   : > { %v1256_v36 = vsel %vm1029_vm2, %v2455_v21, 0.0 }
 0x326   : > { %v2457_v35 = vpop.eup %2456 }
 0x327   : > { %v1259_v37 = vsel %vm1029_vm2, %v2457_v35, 0.0 }
 0x34e   : > { %v1282_v45 = vpop.trf.xlu1 }
 0x350   : > { %v1298_v46 = vpop.trf.xlu0 }
 0x352   : > { %v1330_v47 = vpop.trf.xlu1 }
 0x354   : > { %v1314_v48 = vpop.trf.xlu0 }
 0x356   : > { %v1362_v39 = vpop.trf.xlu1 }
 0x357   : > { %v1436_v51 = vcombine.low %v1298_v46, %v1362_v39 }
 0x358   : > { %v1346_v49 = vpop.trf.xlu0 }
 0x359   : > { %v1402_v53 = vcombine.low %v1282_v45, %v1346_v49  ;;  %v1443_v57 = vrot.slane %v1436_v51, %v2633_v12 }
 0x35a   : > { %v1394_v52 = vpop.trf.xlu1 }
 0x35b   : > { %v1444_v55 = vcombine.low %v1330_v47, %v1394_v52  ;;  %v1409_v61 = vrot.slane %v1402_v53, %v2633_v12 }
 0x35c   : > { %v1378_v56 = vpop.trf.xlu0 }
 0x35d   : > { %v1451_v58 = vrot.slane %v1444_v55, %v2633_v12  ;;  %v1410_v59 = vcombine.low %v1314_v48, %v1378_v56 }
 0x35f   : > { %v1452_v62 = vcombine.low %v1443_v57, %v1451_v58  ;;  %v1417_v63 = vrot.slane %v1410_v59, %v2633_v12  ;;  %v1453_v8 = vcombine.high %v1443_v57, %v1451_v58 }
 0x361   : > { %v1418_v0 = vcombine.low %v1409_v61, %v1417_v63  ;;  %v1460_v1 = vrot.slane %v1452_v62, %v2637_v23  ;;  %v1419_v3 = vcombine.high %v1409_v61, %v1417_v63  ;;  %v1467_v24 = vrot.slane %v1453_v8, %v2637_v23 }
 0x363   : > { %v1426_v4 = vrot.slane %v1418_v0, %v2637_v23  ;;  %v1475_v9 = vshrl.u32 %v1460_v1, 16  ;;  %v1468_v16 = vcombine.high %v1460_v1, %v2533_v34  ;;  %v1433_v11 = vrot.slane %v1419_v3, %v2637_v23 }
 0x364   : > { %v1491_v29 = vshrl.u32 %v1467_v24, 16  ;;  %v1469_v40 = vcombine.high %v1467_v24, %v2533_v34 }
 0x365   : > { %v1472_v10 = vpack.i.b16 %v1460_v1, %v1426_v4  ;;  %v1474_v14 = vshrl.u32 %v1426_v4, 16  ;;  %v1434_v15 = vcombine.high %v1426_v4, %v2533_v34  ;;  %v1483_v13 = vshrl.u32 %v1468_v16, 16 }
 0x366   : > { %v1490_v27 = vshrl.u32 %v1433_v11, 16  ;;  %v1488_v28 = vpack.i.b16 %v1467_v24, %v1433_v11  ;;  %v1435_v38 = vcombine.high %v1433_v11, %v2533_v34  ;;  %v1499_v43 = vshrl.u32 %v1469_v40, 16 }
 0x367   : > { %1502 = vxpose.xlu0.c.b16.start.end [1/1] (short) (narrow) %v1472_v10, 16  ;;  %v1476_v19 = vpack.i.b16 %v1475_v9, %v1474_v14  ;;  %v1482_v50 = vshrl.u32 %v1434_v15, 16  ;;  %v1480_v54 = vpack.i.b16 %v1468_v16, %v1434_v15 }
 0x368   : > { %v1492_v30 = vpack.i.b16 %v1491_v29, %v1490_v27  ;;  %v1498_v41 = vshrl.u32 %v1435_v38, 16  ;;  %v1496_v42 = vpack.i.b16 %v1469_v40, %v1435_v38 }
 0x369   : > { %1518 = vxpose.xlu1.c.b16.start.end [1/1] (short) (narrow) %v1476_v19, 16  ;;  %v1484_v26 = vpack.i.b16 %v1483_v13, %v1482_v50 }
 0x36a   : > { %v1500_v44 = vpack.i.b16 %v1499_v43, %v1498_v41 }
 0x36b   : > { %1534 = vxpose.xlu0.c.b16.start.end [1/1] (short) (narrow) %v1480_v54, 16 }
 0x36d   : > { %1550 = vxpose.xlu1.c.b16.start.end [1/1] (short) (narrow) %v1484_v26, 16 }
 0x36f   : > { %1566 = vxpose.xlu0.c.b16.start.end [1/1] (short) (narrow) %v1488_v28, 16 }
 0x371   : > { %1582 = vxpose.xlu1.c.b16.start.end [1/1] (short) (narrow) %v1492_v30, 16 }
 0x37c   : > { %1251 = vadd.xlane.f32.xlu0 %v1250_v32 }
 0x37e   : > { %1254 = vadd.xlane.f32.xlu1 %v1253_v33 }
 0x380   : > { %1257 = vadd.xlane.f32.xlu0 %v1256_v36 }
 0x382   : > { %1260 = vadd.xlane.f32.xlu1 %v1259_v37 }
 0x3ad   : > { %1598 = vxpose.xlu0.c.b16.start.end [1/1] (short) (narrow) %v1496_v42, 16 }
 0x3af   : > { %1614 = vxpose.xlu1.c.b16.start.end [1/1] (short) (narrow) %v1500_v44, 16 }
 0x3c9   : > { %v1510_v45 = vpop.trf.xlu0 }
 0x3cb   : > { %v1526_v46 = vpop.trf.xlu1 }
 0x3cd   : > { %v1542_v47 = vpop.trf.xlu0 }
 0x3cf   : > { %v1558_v48 = vpop.trf.xlu1 }
 0x3d1   : > { %v1574_v39 = vpop.trf.xlu0 }
 0x3d2   : > { %v1630_v59 = vcombine.low %v1510_v45, %v1574_v39 }
 0x3d3   : > { %v1590_v49 = vpop.trf.xlu1 }
 0x3d4   : > { %v1655_v57 = vcombine.low %v1526_v46, %v1590_v49  ;;  %v1637_v5 = vrot.slane %v1630_v59, %v2633_v12 }
 0x3d6   : > { %v1662_v1 = vrot.slane %v1655_v57, %v2633_v12 }
 0x405   : > { %v1252_v51 = vpop.xlane.xlu0 %1251 }
 0x406   : > { %2458 = vrcp.f32 %v1252_v51 }
 0x407   : > { %v1255_v52 = vpop.xlane.xlu1 %1254 }
 0x408   : > { %2460 = vrcp.f32 %v1255_v52 }
 0x409   : > { %v1258_v53 = vpop.xlane.xlu0 %1257 }
 0x40a   : > { %2462 = vrcp.f32 %v1258_v53 }
 0x40b   : > { %v1261_v55 = vpop.xlane.xlu1 %1260 }
 0x40c   : > { %2464 = vrcp.f32 %v1261_v55 }
 0x40f   : > { %v1606_v56 = vpop.trf.xlu0 }
 0x410   : > { %v1638_v58 = vcombine.low %v1542_v47, %v1606_v56 }
 0x411   : > { %v1622_v61 = vpop.trf.xlu1 }
 0x412   : > { %v1663_v62 = vcombine.low %v1558_v48, %v1622_v61  ;;  %v1645_v0 = vrot.slane %v1638_v58, %v2633_v12 }
 0x413   : > { %v2459_v63 = vpop.eup %2458 }
 0x414   : > { %v1670_v2 = vrot.slane %v1663_v62, %v2633_v12  ;;  %v1266_v3 = vmul.f32 %v2459_v63, %v2451_v7  ;;  %v1646_v15 = vcombine.low %v1637_v5, %v1645_v0 }
 0x415   : > { %v2461_v4 = vpop.eup %2460 }
 0x416   : > { %v1671_v8 = vcombine.low %v1662_v1, %v1670_v2  ;;  %v1270_v9 = vpack.c.bf16 %v1266_v3, %v1266_v3  ;;  %2160 = vst.msk [vmem:[%s2817_s10] sm:$0xff] %vm1029_vm2, %v1266_v3  ;;  %v1267_v10 = vmul.f32 %v2461_v4, %v2453_v31  ;;  %v1653_v11 = vrot.slane %v1646_v15, %v2637_v23 }
 0x417   : > { %v2463_v14 = vpop.eup %2462 }
 0x418   : > { %v1696_v16 = vsel %vm1029_vm2, %v1270_v9, 0  ;;  %2161 = vst.msk [vmem:[%s2817_s10 + $0x8] sm:$0xff] %vm1029_vm2, %v1267_v10  ;;  %v1678_v18 = vrot.slane %v1671_v8, %v2637_v23  ;;  %v1271_v19 = vpack.c.bf16 %v1267_v10, %v1267_v10  ;;  %v1268_v50 = vmul.f32 %v2463_v14, %v2455_v21 }
 0x419   : > { %v2465_v17 = vpop.eup %2464  ;;  %2376 = vmatpush3.bf16.xpose.msra.mxu0 %v1696_v16  ;;  %v1683_v25 = vshrl.u32 %v1653_v11, 16  ;;  %v1654_v29 = vcombine.high %v1653_v11, %v2533_v34 }
 0x41a   : > { %2387 = vmatprep.subr.bf16.mxu0 %v2534_v60  ;;  %v1742_v20 = vsel %vm1029_vm2, %v1271_v19, 0  ;;  %2162 = vst.msk [vmem:[%s2817_s10 + $0x10] sm:$0xff] %vm1029_vm2, %v1268_v50  ;;  %v1269_v22 = vmul.f32 %v2465_v17, %v2457_v35  ;;  %v1272_v54 = vpack.c.bf16 %v1268_v50, %v1268_v50  ;;  %v1684_v13 = vshrl.u32 %v1678_v18, 16 }
 0x41b   : > { %2382 = vmatpush3.bf16.xpose.msra.mxu1 %v1742_v20  ;;  %v1682_v24 = vpack.i.b16 %v1678_v18, %v1653_v11  ;;  %v1679_v6 = vcombine.high %v1678_v18, %v2533_v34  ;;  %v1689_v32 = vshrl.u32 %v1654_v29, 16 }
 0x41c   : > { %2393 = vmatprep.subr.bf16.mxu1 %v2534_v60  ;;  %2163 = vst.msk [vmem:[%s2817_s10 + $0x18] sm:$0xff] %vm1029_vm2, %v1269_v22  ;;  %v1273_v26 = vpack.c.bf16 %v1269_v22, %v1269_v22  ;;  %v1788_v27 = vsel %vm1029_vm2, %v1272_v54, 0  ;;  %v1685_v28 = vpack.i.b16 %v1684_v13, %v1683_v25 }
 0x41d   : > { %v1690_v7 = vshrl.u32 %v1679_v6, 16  ;;  %v1688_v31 = vpack.i.b16 %v1679_v6, %v1654_v29 }
 0x41e   : > { %v1834_v30 = vsel %vm1029_vm2, %v1273_v26, 0 }
 0x41f   : > { %v1691_v21 = vpack.i.b16 %v1690_v7, %v1689_v32 }
 0x420   : > { %2378 = vmatmul.mubr.msk.bf16.vlgmr.msra.gmra.mxu0 %vm1029_vm2, %v1682_v24 }
 0x421   : > { %2388 = vmatpush3.bf16.xpose.msra.mxu0 %v1788_v27  ;;  %2389 = vmatprep.mubr.msk.bf16.mxu0 %vm2535_vm0, %v2534_v60 }
 0x422   : > { %2384 = vmatmul.mubr.msk.bf16.vlgmr.msra.gmra.mxu1 %vm1029_vm2, %v1685_v28 }
 0x423   : > { %2394 = vmatpush3.bf16.xpose.msra.mxu1 %v1834_v30  ;;  %2395 = vmatprep.mubr.msk.bf16.mxu1 %vm2535_vm0, %v2534_v60 }
 0x428   : > { %2390 = vmatmul.mubr.msk.bf16.vlgmr.msra.gmra.mxu0 %vm1029_vm2, %v1688_v31 }
 0x42a   : > { %2396 = vmatmul.mubr.msk.bf16.vlgmr.msra.gmra.mxu1 %vm1029_vm2, %v1691_v21 }
 0x4e0   : > { %v1732_v33 = vpop.f32.mrf.mxu0 }
 0x4e1   : > { %1876 = vxpose.xlu0.b32.start.end [1/1] (short) (narrow) %v1732_v33, 8 }
 0x4e2   : > { %v2379_v35 = vpop.f32.mrf.mxu0  ;;  %v1778_v34 = vpop.f32.mrf.mxu1 }
 0x4e3   : > { %1908 = vxpose.xlu1.b32.start.end [1/1] (short) (narrow) %v1778_v34, 8 }
 0x4e4   : > { %v1735_v36 = vpop.f32.mrf.mxu0  ;;  %v2385_v37 = vpop.f32.mrf.mxu1 }
 0x4e6   : > { %v2380_v38 = vpop.f32.mrf.mxu0  ;;  %v1781_v40 = vpop.f32.mrf.mxu1 }
 0x4e8   : > { %v1824_v41 = vpop.f32.mrf.mxu0  ;;  %v2386_v42 = vpop.f32.mrf.mxu1 }
 0x4e9   : > { %1940 = vxpose.xlu0.b32.start.end [1/1] (short) (narrow) %v1824_v41, 8 }
 0x4ea   : > { %v2391_v60 = vpop.f32.mrf.mxu0  ;;  %v1870_v43 = vpop.f32.mrf.mxu1 }
 0x4ec   : > { %v1827_v44 = vpop.f32.mrf.mxu0  ;;  %v2397_v45 = vpop.f32.mrf.mxu1 }
 0x4ed   : > { %1972 = vxpose.xlu0.b32.start.end [1/1] (short) (narrow) %v1870_v43, 8 }
 0x4ee   : > { %v2392_v46 = vpop.f32.mrf.mxu0  ;;  %v1873_v47 = vpop.f32.mrf.mxu1 }
 0x4f0   : > { %v2398_v48 = vpop.f32.mrf.mxu1 }
 0x55d   : > { %v1892_v39 = vpop.trf.xlu0 }
 0x55f   : > { %v1924_v51 = vpop.trf.xlu1 }
 0x565   : > { %v1956_v49 = vpop.trf.xlu0 }
 0x566   : > { %v2004_v52 = vcombine.low %v1892_v39, %v1956_v49  ;;  %v2005_v53 = vcombine.high %v1892_v39, %v1956_v49 }
 0x568   : > { %v2012_v58 = vrot.slane %v2004_v52, %v2633_v12  ;;  %v2019_v59 = vrot.slane %v2005_v53, %v2633_v12 }
 0x569   : > { %v1988_v55 = vpop.trf.xlu0 }
 0x56a   : > { %v2020_v56 = vcombine.low %v1924_v51, %v1988_v55  ;;  %v2021_v57 = vcombine.high %v1924_v51, %v1988_v55 }
 0x56c   : > { %v2028_v61 = vrot.slane %v2020_v56, %v2633_v12  ;;  %v2035_v62 = vrot.slane %v2021_v57, %v2633_v12 }
 0x56e   : > { %v2036_v63 = vcombine.low %v2012_v58, %v2028_v61  ;;  %v2037_v0 = vcombine.high %v2012_v58, %v2028_v61  ;;  %v2052_v1 = vcombine.low %v2019_v59, %v2035_v62  ;;  %v2053_v2 = vcombine.high %v2019_v59, %v2035_v62 }
 0x570   : > { %v2044_v3 = vrot.slane %v2036_v63, %v2637_v23  ;;  %v2051_v4 = vrot.slane %v2037_v0, %v2637_v23  ;;  %v2060_v5 = vrot.slane %v2052_v1, %v2637_v23  ;;  %v2067_v8 = vrot.slane %v2053_v2, %v2637_v23 }
 0x572   : > { %v2072_v9 = vcombine.low %v2044_v3, %v2051_v4  ;;  %v2327_v10 = vcombine.high %v2044_v3, %v2051_v4  ;;  %v2088_v14 = vcombine.low %v2060_v5, %v2067_v8  ;;  %v2328_v15 = vcombine.high %v2060_v5, %v2067_v8 }
 0x574   : > { %v2079_v16 = vrot.slane %v2072_v9, %v2633_v12  ;;  %v2087_v17 = vrot.slane %v2327_v10, %v2633_v12  ;;  %v2095_v18 = vrot.slane %v2088_v14, %v2633_v12  ;;  %v2103_v19 = vrot.slane %v2328_v15, %v2633_v12 }
 0x576   : > { %v2105_v50 = vcombine.high %v2079_v16, %v2087_v17  ;;  %v2121_v11 = vcombine.high %v2095_v18, %v2103_v19  ;;  %v2104_v20 = vcombine.low %v2079_v16, %v2087_v17  ;;  %v2120_v22 = vcombine.low %v2095_v18, %v2103_v19 }
 0x578   : > { %v2119_v54 = vrot.slane %v2105_v50, %v2637_v23  ;;  %v2135_v13 = vrot.slane %v2121_v11, %v2637_v23  ;;  %v2112_v24 = vrot.slane %v2104_v20, %v2637_v23  ;;  %v2128_v12 = vrot.slane %v2120_v22, %v2637_v23 }
 0x579   : > { %2479 = shalt.err (!%p2476_p3)
}
 0x57a   : > { %s2480_s26 = scalar_lea.hbm %s2861_s14, 512  ;;  %s2484_s30 = scalar_lea.hbm %s2922_s5, 1024 }
 0x57b   : > { %p2481_p4 = scmp.ne.s32.totalorder %s2861_s14, %s2480_s26  ;;  %p2485_p9 = scmp.lt.s32.totalorder %s2861_s14, %s2922_s5 }
 0x57c   : > { %p2486_p10 = scmp.lt.s32.totalorder %s2484_s30, %s2480_s26 }
 0x57d   : > { %p2482_p7 = pnand %p2481_p4, %p2609_p5 }
 0x57e   : > { %p2487_p11 = por %p2486_p10, %p2485_p9 }
 0x57f   : > { %p2483_p8 = pneg %p2482_p7 }
 0x581   : > { %p2488_p12 = pnand %p2487_p11, %p2483_p8 }
 0x583   : > { %2491 = shalt.err (!%p2488_p12)
}
 0x584   : > { %s2537_s11 = smov 128   ;;  %s2538_s12 = smov 8   ;;  %v2138_v23 = vcombine.low %v2119_v54, %v2135_v13  ;;  %v2137_v25 = vcombine.high %v2112_v24, %v2128_v12  ;;  %v2136_v26 = vcombine.low %v2112_v24, %v2128_v12  ;;  %v2139_v27 = vcombine.high %v2119_v54, %v2135_v13 }
 0x585   : > { %2399 = dma.vmem_to_hbm [thread:$0]  (%p2609_p5), %s2868_s15, 512, %s2861_s14, %s2872_s22, %s2537_s11, %s2537_s11, %s2538_s12   ;;  %vm2153_vm5 = vcmask 130048   ;;  %vm2155_vm6 = vcmask 195584   ;;  %vm2158_vm7 = vcmask 257024  }
 0x586   : > { %s2539_s13 = smov 16   ;;  %2141 = vrot.lane.b32.xlu1 %v2137_v25, %s2538_s12  ;;  %s2540_s16 = smov 24  }
 0x587   : > { %2145 = vrot.lane.b32.xlu0 %v2138_v23, %s2539_s13  ;;  %s281_s15 = scalar_lea.vmem %s2921_s4, %s2624_s6 }
 0x58a   : > { %2149 = vrot.lane.b32.xlu1 %v2139_v27, %s2540_s16 }
 0x5f8   : > { %v2142_v6 = vpop.permute.xlu1 %2141 }
 0x5f9   : > { %v2146_v28 = vpop.permute.xlu0 %2145  ;;  %v2152_v29 = vsel %vm1029_vm2, %v2136_v26, %v2142_v6 }
 0x5fa   : > { %v2154_v7 = vsel %vm2153_vm5, %v2152_v29, %v2146_v28 }
 0x5fc   : > { %v2150_v30 = vpop.permute.xlu1 %2149 }
 0x5fd   : > { %v2156_v31 = vsel %vm2155_vm6, %v2154_v7, %v2150_v30 }
 0x5fe   : > { %v2157_v32 = vpack.c.bf16 %v2156_v31, %v2156_v31 }
 0x600   : > { %2159 = vst.msk [vmem:[%s281_s15] sm:$0xf] %vm2158_vm7, %v2157_v32 }
 0x601 PF: > { %p2405_p5 = scmp.ge.s32.totalorder %s2526_s21, 2  ;;  %s2207_s22 = sand.u32 1, %s2514_s18  }
 0x602   : > { %s2208_s17 = scalar_lea.sflag [#allocation3], %s2207_s22 }
 0x603   : > { %p2402_p13 = pnand %p2405_p5, %p2613_p6 }
 0x605   : > { %p2403_p0 = pneg %p2402_p13 }
 0x607   : > { %2509 = dma.done.wait (%p2403_p0), %s2208_s17, 512  }
 0x608   : > { %2511 = vsyncadd (%p2403_p0), %s2208_s17, 4294966784  ;;  %p16_p1 = scmp.ge.s32.totalorder %s2596_s24, 4   ;;  %s2927_s18 = smov %s2518_s19 }
 0x609   : > { %s2928_s19 = smov %s2522_s20  ;;  %s2929_s20 = smov %s2607_s27 }
 0x60a   : > { %s2930_s21 = smov %s2596_s24  ;;  %18 = sbr.rel (!%p16_p1) target bundleno = 3 (0x3), region = 92 }
 0x60f   :  { %2213 = vsyncpa [#allocation3], 1 }
 0x610   :  { %2215 = vsyncpa [#allocation3 + $0x1], 1 }

// kernel: encoder_layer_forward.7
= control target key start
LH: loop header
LB: loop body
LE: loop exit
PB: predicated region body
PF: predicated region fallthrough
CT: control target
= control target key end

     0   :  { %v328_v1 = vmov 0.0   ;;  %vm329_vm0 = vmmov 0   ;;  %vm54_vm1 = vcmask 261120   ;;  %s419_s0 = inlined_call_operand.vmem [shape: f32[16,32], index: 0, kind: input, shape index: {}]   ;;  %s420_s1 = inlined_call_operand.vmem [shape: bf16[32,64], index: 1, kind: input, shape index: {}]   ;;  %s421_s2 = inlined_call_operand.vmem [shape: f32[1,64], index: 2, kind: input, shape index: {}]   ;;  %s422_s3 = inlined_call_operand.vmem [shape: bf16[64,32], index: 3, kind: input, shape index: {}]   ;;  %s423_s4 = inlined_call_operand.vmem [shape: f32[1,32], index: 4, kind: input, shape index: {}]   ;;  %s424_s5 = inlined_call_operand.vmem [shape: f32[1,32], index: 5, kind: input, shape index: {}]   ;;  %s425_s6 = inlined_call_operand.vmem [shape: f32[1,32], index: 6, kind: input, shape index: {}]   ;;  %s426_s7 = inlined_call_operand.hbm [shape: f32[16,32], index: 7, kind: output, shape index: {}]  }
   0x1   :  { %v296_v0 = vld [vmem:[%s420_s1 + $0x8] sm:$0xff]   ;;  %271 = vmatprep.subr.bf16.mxu0 %v328_v1  ;;  %v297_v2 = vld [vmem:[%s420_s1] sm:$0xff]   ;;  %279 = vmatprep.subr.bf16.mxu1 %v328_v1  ;;  %v298_v5 = vld [vmem:[%s422_s3 + $0x18] sm:$0xff]  }
   0x2   :  { %272 = vmatpush3.bf16.msra.mxu0 %v296_v0  ;;  %275 = vmatprep.mubr.msk.bf16.mxu0 %vm329_vm0, %v328_v1  ;;  %v28_v3 = vld [vmem:[%s419_s0] sm:$0xff]  ;;  %v29_v4 = vld [vmem:[%s419_s0 + $0x8] sm:$0xff] }
   0x3   :  { %273 = vmatprep.subr.bf16.mxu0 %v328_v1  ;;  %287 = vmatprep.mubr.msk.bf16.mxu1 %vm329_vm0, %v328_v1  ;;  %v30_v6 = vpack.c.bf16 %v29_v4, %v28_v3 }
   0x4   :  { %280 = vmatpush3.bf16.msra.mxu1 %v298_v5 }
   0x5   :  { %281 = vmatprep.subr.bf16.mxu1 %v328_v1 }
   0x6   :  { %274 = vmatpush3.bf16.msra.mxu0 %v297_v2 }
   0x7   :  { %12 = vsyncpa [#allocation3], 0  ;;  %v299_v7 = vld [vmem:[%s422_s3 + $0x10] sm:$0xff]   ;;  %v300_v8 = vld [vmem:[%s422_s3 + $0x8] sm:$0xff]   ;;  %vm141_vm2 = vcmask 523264   ;;  %s330_s20 = smov [#allocation2]  }
   0x8   :  { %282 = vmatpush3.bf16.msra.mxu1 %v299_v7  ;;  %v301_v9 = vld [vmem:[%s422_s3] sm:$0xff]   ;;  %s240_s21 = sshll.u32 %s330_s20, 4  ;;  %s241_s21 = int_to_ptr.vmem [resolvable:$true] %s240_s21 }
   0x9   :  { %276 = vmatmul.mubr.msk.bf16.vlgmr.msra.gmra.mxu0 %vm54_vm1, %v30_v6  ;;  %283 = vmatprep.subr.bf16.mxu1 %v328_v1  ;;  %v251_v10 = vld [vmem:[%s421_s2] ss:$0 sm:$0xff]  ;;  %s306_s22 = scalar_lea.vmem %s241_s21, 256  ;;  %p311_p1 = scmp.lt.s32.totalorder %s241_s21, %s241_s21 }
   0xa   :  { %v255_v20 = vld [vmem:[%s423_s4] ss:$0 sm:$0xff]  ;;  %p307_p0 = scmp.ne.s32.totalorder %s241_s21, %s306_s22  ;;  %p312_p2 = scmp.lt.s32.totalorder %s306_s22, %s306_s22 }
   0xb   :  { %v261_v48 = vld [vmem:[%s424_s5] ss:$0 sm:$0xff] }
   0xc   :  { %284 = vmatpush3.bf16.msra.mxu1 %v300_v8  ;;  %v262_v50 = vld [vmem:[%s425_s6] ss:$0 sm:$0xff]  ;;  %p313_p3 = por %p312_p2, %p311_p1 }
   0xd   :  { %285 = vmatprep.subr.bf16.mxu1 %v328_v1 }
   0xe   :  { %p314_p4 = pnand %p313_p3, %p307_p0 }
  0x10   :  { %286 = vmatpush3.bf16.msra.mxu1 %v301_v9 }
  0xc9   :  { %v92_v11 = vpop.f32.mrf.mxu0 }
  0xca   :  { %v93_v13 = vadd.f32 %v251_v10, %v92_v11 }
  0xcb   :  { %v277_v12 = vpop.f32.mrf.mxu0 }
  0xcc   :  { %v99_v17 = vmax.f32 %v93_v13, 0.0 }
  0xcd   :  { %v95_v14 = vpop.f32.mrf.mxu0 }
  0xce   :  { %v96_v15 = vadd.f32 %v251_v10, %v95_v14 }
  0xcf   :  { %v278_v16 = vpop.f32.mrf.mxu0 }
  0xd0   :  { %v100_v18 = vmax.f32 %v96_v15, 0.0 }
  0xd2   :  { %v101_v19 = vpack.c.bf16 %v100_v18, %v99_v17 }
  0xd4   :  { %288 = vmatmul.mubr.msk.bf16.vlgmr.msra.gmra.mxu1 %vm141_vm2, %v101_v19 }
 0x194   :  { %v179_v21 = vpop.f32.mrf.mxu1 }
 0x195   :  { %v180_v22 = vadd.f32 %v255_v20, %v179_v21 }
 0x196   :  { %v289_v23 = vpop.f32.mrf.mxu1 }
 0x197   :  { %v186_v24 = vadd.f32 %v180_v22, %v28_v3 }
 0x198   :  { %v182_v25 = vpop.f32.mrf.mxu1 }
 0x199   :  { %v183_v26 = vadd.f32 %v255_v20, %v182_v25  ;;  %v188_v27 = vsel %vm54_vm1, %v186_v24, 0.0 }
 0x19a   :  { %189 = vadd.xlane.f32.xlu0 %v188_v27  ;;  %v290_v28 = vpop.f32.mrf.mxu1 }
 0x19b   :  { %v187_v29 = vadd.f32 %v183_v26, %v29_v4 }
 0x19d   :  { %v191_v30 = vsel %vm54_vm1, %v187_v29, 0.0 }
 0x19e   :  { %192 = vadd.xlane.f32.xlu0 %v191_v30 }
 0x223   :  { %v190_v31 = vpop.xlane.xlu0 %189 }
 0x224   :  { %v195_v32 = vmul.f32 0.03125, %v190_v31 }
 0x226   :  { %v197_v33 = vsub.f32 %v186_v24, %v195_v32 }
 0x227   :  { %v193_v34 = vpop.xlane.xlu0 %192 }
 0x228   :  { %v196_v35 = vmul.f32 0.03125, %v193_v34  ;;  %v199_v36 = vmul.f32 %v197_v33, %v197_v33 }
 0x22a   :  { %v198_v37 = vsub.f32 %v187_v29, %v196_v35  ;;  %v201_v38 = vsel %vm54_vm1, %v199_v36, 0.0 }
 0x22b   :  { %202 = vadd.xlane.f32.xlu1 %v201_v38 }
 0x22c   :  { %v200_v39 = vmul.f32 %v198_v37, %v198_v37 }
 0x22e   :  { %v204_v40 = vsel %vm54_vm1, %v200_v39, 0.0 }
 0x22f   :  { %205 = vadd.xlane.f32.xlu1 %v204_v40 }
 0x2b4   :  { %v203_v41 = vpop.xlane.xlu1 %202 }
 0x2b5   :  { %v207_v42 = vmul.f32 0.03125, %v203_v41 }
 0x2b7   :  { %v209_v43 = vadd.f32 1e-06, %v207_v42 }
 0x2b8   :  { %v206_v44 = vpop.xlane.xlu1 %205 }
 0x2b9   :  { %302 = vrsqrt.f32 %v209_v43  ;;  %v208_v45 = vmul.f32 0.03125, %v206_v44 }
 0x2bb   :  { %v210_v46 = vadd.f32 1e-06, %v208_v45 }
 0x2bd   :  { %304 = vrsqrt.f32 %v210_v46 }
 0x2c6   :  { %v303_v47 = vpop.eup %302 }
 0x2c7   :  { %v213_v49 = vmul.f32 %v303_v47, %v197_v33 }
 0x2c9   :  { %v222_v51 = vmul.f32 %v261_v48, %v213_v49 }
 0x2ca   :  { %v305_v52 = vpop.eup %304 }
 0x2cb   :  { %v214_v53 = vmul.f32 %v305_v52, %v198_v37  ;;  %v231_v54 = vadd.f32 %v262_v50, %v222_v51 }
 0x2cd   :  { %v223_v55 = vmul.f32 %v261_v48, %v214_v53  ;;  %233 = vst.msk [vmem:[#allocation2] sm:$0xff] %vm54_vm1, %v231_v54 }
 0x2cf   :  { %v232_v56 = vadd.f32 %v262_v50, %v223_v55 }
 0x2d1   :  { %234 = vst.msk [vmem:[#allocation2 + $0x8] sm:$0xff] %vm54_vm1, %v232_v56 }
 0x2d2   :  { %317 = shalt.err (!%p314_p4)
}
 0x2d3   :  { %s331_s5 = smov 128   ;;  %s332_s6 = smov 8  }
 0x2d4   :  { %246 = dma.vmem_to_hbm [thread:$0]  %s241_s21, 256, %s426_s7, [#allocation3], %s331_s5, %s331_s5, %s332_s6  }
 0x2d5   :  { %326 = dma.done.wait [#allocation3], 256  }
 0x2d6   :  { %327 = vsyncadd [#allocation3], 4294967040 }
 0x2d7   :  { %250 = vsyncpa [#allocation3], 1 }

</bundles_post_ra>
